<compile_context>
chip_gen: v6e
topology: v6e:2x2x1
jax: 0.10.0
libtpu: 0.0.40
codegen_flags: <defaults>
</compile_context>

<pallas_src>
import functools

import jax
import jax.numpy as jnp
import numpy as np
from jax import lax
from jax.experimental import pallas as pl
from jax.experimental.pallas import tpu as pltpu

EMB_DIM = 640        # encoder embedding width
GLOBAL_OUT = 64      # global_w = Conv2d(640, 64, 1)
GLOBAL_PAD = 128     # global head padded to a full 128-lane tile
SUBLANE = 8


def _round_up(v, m):
    return (v + m - 1) // m * m


# ----------------------------------------------------------------------------
# Fused kernel: stand-in encoder matmul -> prototype logits -> global_w head.
# instance_embs never leaves VMEM.
# ----------------------------------------------------------------------------
def _protonet_fused_kernel(x_ref, w_enc_ref, b_enc_ref, w_g_ref, b_g_ref,
                           logits_ref, class_ref, emb_ref,
                           *, way, shot, inv_temp):
    # --- stand-in encoder: [N_pad, K] @ [K, 640] + b  (bf16 operands, f32 acc)
    # TODO(synk): real ConvNet/ResNet12/WRN28 encoder is an external module.
    emb = jnp.dot(x_ref[...], w_enc_ref[...],
                  preferred_element_type=jnp.float32) + b_enc_ref[...]
    emb_ref[...] = emb                      # instance_embs resident in VMEM scratch

    emb_f32 = emb_ref[...]                  # [N_pad, 640] f32
    emb_bf = emb_f32.astype(jnp.bfloat16)   # MXU operand copy

    # --- proto = support.mean(shot axis); support rows are shot-major
    #     (row index = s * way + w), matching split_instances().
    proto = emb_f32[0:way, :]
    for s in range(1, shot):                # static unroll (shot is tiny)
        proto = proto + emb_f32[s * way:(s + 1) * way, :]
    proto = proto * (1.0 / shot)            # [way, 640] f32

    # --- logits = -||e - proto||^2 / T, expanded so the cross term hits the MXU.
    #     Distances are computed for every row; the wrapper slices the query rows
    #     (avoids a non-8-aligned row slice in-kernel).
    q_sq = jnp.sum(emb_f32 * emb_f32, axis=-1, keepdims=True)      # [N_pad, 1] f32
    p_sq = jnp.sum(proto * proto, axis=-1, keepdims=True)          # [way, 1]  f32
    # RHS-last contraction (flash-attention-standard), bf16 operands, f32 acc.
    cross = lax.dot_general(
        emb_bf, proto.astype(jnp.bfloat16),
        dimension_numbers=(((1,), (1,)), ((), ())),
        preferred_element_type=jnp.float32)                        # [N_pad, way]
    # [way,1] -> [1,way] is a single-vreg relayout, off the MXU critical path.
    d2 = q_sq - 2.0 * cross + jnp.transpose(p_sq)
    logits_ref[...] = (-d2 * inv_temp).astype(logits_ref.dtype)

    # --- class_embs = global_w 1x1 conv == [N_pad, 640] @ [640, 128] + b
    #     (output lanes padded to 128 -> unmasked, lane-dense stores).
    cls = jnp.dot(emb_bf, w_g_ref[...], preferred_element_type=jnp.float32)
    class_ref[...] = (cls + b_g_ref[...]).astype(class_ref.dtype)


def _protonet_fused_call(x_flat_bf, w_enc_bf, b_enc, w_g_bf, b_g,
                         *, way, shot, temperature):
    n_pad, k_in = x_flat_bf.shape
    k_in2, d = w_enc_bf.shape
    d2_, g_pad = w_g_bf.shape
    assert k_in == k_in2 and d == EMB_DIM and d2_ == EMB_DIM and g_pad == GLOBAL_PAD
    assert n_pad % SUBLANE == 0

    kern = functools.partial(_protonet_fused_kernel, way=way, shot=shot,
                             inv_temp=1.0 / float(temperature))

    flops = (2 * n_pad * k_in * d            # encoder matmul
             + 2 * n_pad * d * way           # query/proto cross term
             + 2 * n_pad * d * g_pad         # global_w head
             + 8 * n_pad * d)                # elementwise (squares, sums, scale)
    bytes_accessed = (x_flat_bf.size * 2 + w_enc_bf.size * 2 + b_enc.size * 4
                      + w_g_bf.size * 2 + b_g.size * 4
                      + n_pad * way * 4 + n_pad * g_pad * 4)

    return pl.pallas_call(
        kern,
        out_shape=(jax.ShapeDtypeStruct((n_pad, way), jnp.float32),
                   jax.ShapeDtypeStruct((n_pad, g_pad), jnp.float32)),
        grid=(1,),
        in_specs=[
            pl.BlockSpec((n_pad, k_in), lambda i: (0, 0)),
            pl.BlockSpec((k_in, d), lambda i: (0, 0)),
            pl.BlockSpec((1, d), lambda i: (0, 0)),
            pl.BlockSpec((d, g_pad), lambda i: (0, 0)),
            pl.BlockSpec((1, g_pad), lambda i: (0, 0)),
        ],
        out_specs=[pl.BlockSpec((n_pad, way), lambda i: (0, 0)),
                   pl.BlockSpec((n_pad, g_pad), lambda i: (0, 0))],
        scratch_shapes=[pltpu.VMEM((n_pad, d), jnp.float32)],  # instance_embs
        # TODO(synk): when the real encoder / larger episodes land, add a
        # "parallel" row/episode grid axis (2 TensorCores on v7x) and tile K
        # with sizes re-derived against v7x's 64 MiB VMEM.
        compiler_params=pltpu.CompilerParams(dimension_semantics=("arbitrary",)),
        cost_estimate=pl.CostEstimate(flops=int(flops), transcendentals=0,
                                      bytes_accessed=int(bytes_accessed)),
    )(x_flat_bf, w_enc_bf, b_enc, w_g_bf, b_g)


# ----------------------------------------------------------------------------
# ProtoNet forward (training semantics: returns (logits, class_embs))
# ----------------------------------------------------------------------------
@functools.partial(jax.jit,
                   static_argnames=("way", "shot", "query", "temperature",
                                    "training"))
def protonet_forward(x, params, *, way, shot, query, temperature, training=True):
    # x: [1, N, C, H, W]   (PyTorch NCHW, leading episode dim squeezed)
    x = x[0]
    n = x.shape[0]
    flat = x.reshape(n, -1).astype(jnp.float32)

    # Pad rows to a multiple of 8 sublanes; MXU operands in bf16.
    n_pad = _round_up(n, SUBLANE)
    flat = jnp.pad(flat, ((0, n_pad - n), (0, 0))).astype(jnp.bfloat16)

    logits_all, class_all = _protonet_fused_call(
        flat, params["w_enc_bf"], params["b_enc"],
        params["w_g_pad_bf"], params["b_g_pad"],
        way=way, shot=shot, temperature=temperature)

    ns = way * shot
    nq = way * query
    logits = logits_all[ns:ns + nq]                   # [query*way, way]
    if training:
        # class_embs = global_w(instance_embs[:, :, None, None]).view(-1, 64)
        class_embs = class_all[:n, :GLOBAL_OUT]       # [N, 64]
        # TODO(synk): MemoryBank.add_embedding_memory is stateful host-side
        # bookkeeping with no Pallas equivalent.
        return logits, class_embs
    return logits


# ----------------------------------------------------------------------------
# Deterministic parameter init (mirrors shapes from ProtoNet.__init__)
# ----------------------------------------------------------------------------
def init_params(key, in_feat):
    k_enc, k_gw, k_gb = jax.random.split(key, 3)
    # stand-in encoder: [in_feat, 640]
    w_enc = 0.02 * jax.random.normal(k_enc, (in_feat, EMB_DIM), dtype=jnp.float32)
    b_enc = jnp.zeros((1, EMB_DIM), dtype=jnp.float32)
    # global_w = Conv2d(640, 64, kernel_size=1), xavier_uniform_ weight
    fan_in, fan_out = EMB_DIM, GLOBAL_OUT
    bound = float(np.sqrt(6.0 / (fan_in + fan_out)))
    w_g_oihw = jax.random.uniform(k_gw, (GLOBAL_OUT, EMB_DIM), jnp.float32, -bound, bound)
    w_g = jnp.transpose(w_g_oihw)                     # [640, 64]
    b_bound = float(1.0 / np.sqrt(fan_in))
    b_g = jax.random.uniform(k_gb, (1, GLOBAL_OUT), jnp.float32, -b_bound, b_bound)

    # Kernel-ready operands, prepared ONCE (not per forward): bf16 MXU weights,
    # global head zero-padded to 128 output lanes.
    w_g_pad = jnp.zeros((EMB_DIM, GLOBAL_PAD), jnp.float32).at[:, :GLOBAL_OUT].set(w_g)
    b_g_pad = jnp.zeros((1, GLOBAL_PAD), jnp.float32).at[:, :GLOBAL_OUT].set(b_g)
    return {
        "w_enc": w_enc, "b_enc": b_enc, "w_g": w_g, "b_g": b_g,
        "w_enc_bf": w_enc.astype(jnp.bfloat16),
        "w_g_pad_bf": w_g_pad.astype(jnp.bfloat16),
        "b_g_pad": b_g_pad,
    }


# ----------------------------------------------------------------------------
# Main
# ----------------------------------------------------------------------------
if __name__ == "__main__":
    way, shot, query, temperature = 5, 2, 3, 64.0
    C, H, W = 3, 16, 16
    N = way * (shot + query)                          # 25 images / episode

    key = jax.random.PRNGKey(0)
    k_x, k_p = jax.random.split(key)
    x = jax.random.normal(k_x, (1, N, C, H, W), dtype=jnp.float32)
    params = init_params(k_p, C * H * W)

    logits, class_embs = protonet_forward(
        x, params, way=way, shot=shot, query=query,
        temperature=temperature, training=True)
    logits, class_embs = jax.block_until_ready((logits, class_embs))

    # -------- reference check (numpy mirror of the kernel's bf16/f32 flow) ---
    def bf16_round(a):
        return np.asarray(jnp.asarray(a, jnp.float32)
                          .astype(jnp.bfloat16).astype(jnp.float32))

    xf = np.asarray(x[0], np.float32).reshape(N, -1)
    emb = bf16_round(xf) @ bf16_round(np.asarray(params["w_enc"])) \
        + np.asarray(params["b_enc"])
    ns, nq = way * shot, way * query
    proto = emb[:ns].reshape(shot, way, EMB_DIM).mean(axis=0)
    q = emb[ns:ns + nq]
    cross = bf16_round(q) @ bf16_round(proto).T
    d2 = (q * q).sum(-1, keepdims=True) - 2.0 * cross \
        + (proto * proto).sum(-1)[None, :]
    logits_ref = -d2 / temperature
    class_ref = bf16_round(emb) @ bf16_round(np.asarray(params["w_g"])) \
        + np.asarray(params["b_g"])

    assert logits.shape == (nq, way)
    assert class_embs.shape == (N, GLOBAL_OUT)
    np.testing.assert_allclose(np.asarray(logits), logits_ref, rtol=5e-3, atol=2e-2)
    np.testing.assert_allclose(np.asarray(class_embs), class_ref, rtol=5e-3, atol=2e-2)

    print("KERNEL_OK")
</pallas_src>

<mosaic_0001>
module attributes {stable_mosaic.version = 11 : i64} {
  func.func @_protonet_fused_kernel(%arg0: i32, %arg1: memref<32x768xbf16, #tpu.memory_space<vmem>>, %arg2: memref<768x640xbf16, #tpu.memory_space<vmem>>, %arg3: memref<1x640xf32, #tpu.memory_space<vmem>>, %arg4: memref<640x128xbf16, #tpu.memory_space<vmem>>, %arg5: memref<1x128xf32, #tpu.memory_space<vmem>>, %arg6: memref<32x5xf32, #tpu.memory_space<vmem>>, %arg7: memref<32x128xf32, #tpu.memory_space<vmem>>, %arg8: memref<32x640xf32, #tpu.memory_space<vmem>>) attributes {dimension_semantics = [#tpu.dimension_semantics<arbitrary>], iteration_bounds = array<i64: 1>, scalar_prefetch = 0 : i64, scratch_operands = 1 : i64, tpu.core_type = #tpu.core_type<tc>, window_params = [{pipeline_mode = #tpu.pipeline_mode<synchronous>, transform_indices = @transform_0, window_bounds = array<i64: 32, 768>}, {pipeline_mode = #tpu.pipeline_mode<synchronous>, transform_indices = @transform_1, window_bounds = array<i64: 768, 640>}, {pipeline_mode = #tpu.pipeline_mode<synchronous>, transform_indices = @transform_2, window_bounds = array<i64: 1, 640>}, {pipeline_mode = #tpu.pipeline_mode<synchronous>, transform_indices = @transform_3, window_bounds = array<i64: 640, 128>}, {pipeline_mode = #tpu.pipeline_mode<synchronous>, transform_indices = @transform_4, window_bounds = array<i64: 1, 128>}, {pipeline_mode = #tpu.pipeline_mode<synchronous>, transform_indices = @transform_5, window_bounds = array<i64: 32, 5>}, {pipeline_mode = #tpu.pipeline_mode<synchronous>, transform_indices = @transform_6, window_bounds = array<i64: 32, 128>}]} {
    %c0 = arith.constant 0 : index
    %c0_0 = arith.constant 0 : index
    %0 = vector.load %arg1[%c0, %c0_0] : memref<32x768xbf16, #tpu.memory_space<vmem>>, vector<32x768xbf16>
    %c0_1 = arith.constant 0 : index
    %c0_2 = arith.constant 0 : index
    %1 = vector.load %arg2[%c0_1, %c0_2] : memref<768x640xbf16, #tpu.memory_space<vmem>>, vector<768x640xbf16>
    %cst = arith.constant dense<0.000000e+00> : vector<32x640xf32>
    %2 = tpu.matmul %0, %1, %cst {dimension_numbers = #tpu.dot_dimension_numbers<[1], [0], [0], [1], [0, 0, 1, 1], [], []>} : vector<32x768xbf16>, vector<768x640xbf16>, vector<32x640xf32> -> vector<32x640xf32>
    %c0_3 = arith.constant 0 : index
    %c0_4 = arith.constant 0 : index
    %3 = vector.load %arg3[%c0_3, %c0_4] : memref<1x640xf32, #tpu.memory_space<vmem>>, vector<1x640xf32>
    %4 = vector.broadcast %3 : vector<1x640xf32> to vector<32x640xf32>
    %5 = arith.addf %2, %4 : vector<32x640xf32>
    %c0_5 = arith.constant 0 : index
    %c0_6 = arith.constant 0 : index
    %6 = vector.load %arg8[%c0_5, %c0_6] : memref<32x640xf32, #tpu.memory_space<vmem>>, vector<32x640xf32>
    tpu.vector_store %arg8[%c0_5, %c0_6], %5 {strides = array<i32>} : memref<32x640xf32, #tpu.memory_space<vmem>>, vector<32x640xf32>,
    %c0_7 = arith.constant 0 : index
    %c0_8 = arith.constant 0 : index
    %7 = vector.load %arg8[%c0_7, %c0_8] : memref<32x640xf32, #tpu.memory_space<vmem>>, vector<32x640xf32>
    %8 = arith.truncf %7 : vector<32x640xf32> to vector<32x640xbf16>
    %9 = vector.extract_strided_slice %7 {offsets = [0, 0], sizes = [5, 640], strides = [1, 1]} : vector<32x640xf32> to vector<5x640xf32>
    %10 = vector.extract_strided_slice %7 {offsets = [5, 0], sizes = [5, 640], strides = [1, 1]} : vector<32x640xf32> to vector<5x640xf32>
    %11 = arith.addf %9, %10 : vector<5x640xf32>
    %cst_9 = arith.constant 5.000000e-01 : f32
    %12 = vector.broadcast %cst_9 : f32 to vector<5x640xf32>
    %13 = arith.mulf %11, %12 : vector<5x640xf32>
    %14 = arith.mulf %7, %7 : vector<32x640xf32>
    %cst_10 = arith.constant dense<0.000000e+00> : vector<32xf32>
    %15 = vector.multi_reduction <add>, %14, %cst_10 [1] : vector<32x640xf32> to vector<32xf32>
    %16 = vector.shape_cast %15 : vector<32xf32> to vector<32x1xf32>
    %17 = arith.mulf %13, %13 : vector<5x640xf32>
    %cst_11 = arith.constant dense<0.000000e+00> : vector<5xf32>
    %18 = vector.multi_reduction <add>, %17, %cst_11 [1] : vector<5x640xf32> to vector<5xf32>
    %19 = vector.shape_cast %18 : vector<5xf32> to vector<5x1xf32>
    %20 = arith.truncf %13 : vector<5x640xf32> to vector<5x640xbf16>
    %cst_12 = arith.constant dense<0.000000e+00> : vector<32x5xf32>
    %21 = tpu.matmul %8, %20, %cst_12 {dimension_numbers = #tpu.dot_dimension_numbers<[1], [1], [0], [0], [0, 0, 1, 0], [], []>} : vector<32x640xbf16>, vector<5x640xbf16>, vector<32x5xf32> -> vector<32x5xf32>
    %cst_13 = arith.constant 2.000000e+00 : f32
    %22 = vector.broadcast %cst_13 : f32 to vector<32x5xf32>
    %23 = arith.mulf %22, %21 : vector<32x5xf32>
    %24 = vector.broadcast %16 : vector<32x1xf32> to vector<32x5xf32>
    %25 = arith.subf %24, %23 : vector<32x5xf32>
    %26 = tpu.transpose %19, [1, 0] : vector<5x1xf32> -> vector<1x5xf32>
    %27 = vector.broadcast %26 : vector<1x5xf32> to vector<32x5xf32>
    %28 = arith.addf %25, %27 : vector<32x5xf32>
    %cst_14 = arith.constant 0.000000e+00 : f32
    %29 = vector.broadcast %cst_14 : f32 to vector<32x5xf32>
    %30 = arith.subf %29, %28 : vector<32x5xf32>
    %cst_15 = arith.constant 1.562500e-02 : f32
    %31 = vector.broadcast %cst_15 : f32 to vector<32x5xf32>
    %32 = arith.mulf %30, %31 : vector<32x5xf32>
    %c0_16 = arith.constant 0 : index
    %c0_17 = arith.constant 0 : index
    %33 = vector.load %arg6[%c0_16, %c0_17] : memref<32x5xf32, #tpu.memory_space<vmem>>, vector<32x5xf32>
    tpu.vector_store %arg6[%c0_16, %c0_17], %32 {strides = array<i32>} : memref<32x5xf32, #tpu.memory_space<vmem>>, vector<32x5xf32>,
    %c0_18 = arith.constant 0 : index
    %c0_19 = arith.constant 0 : index
    %34 = vector.load %arg4[%c0_18, %c0_19] : memref<640x128xbf16, #tpu.memory_space<vmem>>, vector<640x128xbf16>
    %cst_20 = arith.constant dense<0.000000e+00> : vector<32x128xf32>
    %35 = tpu.matmul %8, %34, %cst_20 {dimension_numbers = #tpu.dot_dimension_numbers<[1], [0], [0], [1], [0, 0, 1, 1], [], []>} : vector<32x640xbf16>, vector<640x128xbf16>, vector<32x128xf32> -> vector<32x128xf32>
    %c0_21 = arith.constant 0 : index
    %c0_22 = arith.constant 0 : index
    %36 = vector.load %arg5[%c0_21, %c0_22] : memref<1x128xf32, #tpu.memory_space<vmem>>, vector<1x128xf32>
    %37 = vector.broadcast %36 : vector<1x128xf32> to vector<32x128xf32>
    %38 = arith.addf %35, %37 : vector<32x128xf32>
    %c0_23 = arith.constant 0 : index
    %c0_24 = arith.constant 0 : index
    %39 = vector.load %arg7[%c0_23, %c0_24] : memref<32x128xf32, #tpu.memory_space<vmem>>, vector<32x128xf32>
    tpu.vector_store %arg7[%c0_23, %c0_24], %38 {strides = array<i32>} : memref<32x128xf32, #tpu.memory_space<vmem>>, vector<32x128xf32>,
    return
  }
  func.func @transform_0(%arg0: i32) -> (i32, i32) {
    %c0_i32 = arith.constant 0 : i32
    %c0_i32_0 = arith.constant 0 : i32
    %c0_i32_1 = arith.constant 0 : i32
    return %c0_i32, %c0_i32_0 : i32, i32
  }
  func.func @transform_1(%arg0: i32) -> (i32, i32) {
    %c0_i32 = arith.constant 0 : i32
    %c0_i32_0 = arith.constant 0 : i32
    %c0_i32_1 = arith.constant 0 : i32
    return %c0_i32, %c0_i32_0 : i32, i32
  }
  func.func @transform_2(%arg0: i32) -> (i32, i32) {
    %c0_i32 = arith.constant 0 : i32
    %c0_i32_0 = arith.constant 0 : i32
    %c0_i32_1 = arith.constant 0 : i32
    return %c0_i32, %c0_i32_0 : i32, i32
  }
  func.func @transform_3(%arg0: i32) -> (i32, i32) {
    %c0_i32 = arith.constant 0 : i32
    %c0_i32_0 = arith.constant 0 : i32
    %c0_i32_1 = arith.constant 0 : i32
    return %c0_i32, %c0_i32_0 : i32, i32
  }
  func.func @transform_4(%arg0: i32) -> (i32, i32) {
    %c0_i32 = arith.constant 0 : i32
    %c0_i32_0 = arith.constant 0 : i32
    %c0_i32_1 = arith.constant 0 : i32
    return %c0_i32, %c0_i32_0 : i32, i32
  }
  func.func @transform_5(%arg0: i32) -> (i32, i32) {
    %c0_i32 = arith.constant 0 : i32
    %c0_i32_0 = arith.constant 0 : i32
    %c0_i32_1 = arith.constant 0 : i32
    return %c0_i32, %c0_i32_0 : i32, i32
  }
  func.func @transform_6(%arg0: i32) -> (i32, i32) {
    %c0_i32 = arith.constant 0 : i32
    %c0_i32_0 = arith.constant 0 : i32
    %c0_i32_1 = arith.constant 0 : i32
    return %c0_i32, %c0_i32_0 : i32, i32
  }
}

</mosaic_0001>

<bundles_post_ra>
// kernel: protonet_forward.1
= control target key start
LH: loop header
LB: loop body
LE: loop exit
PB: predicated region body
PF: predicated region fallthrough
CT: control target
= control target key end

     0   :  { %12 = vsyncpa [#allocation4], 0  ;;  %s4389_s0 = inlined_call_operand.vmem [shape: bf16[32,768], index: 0, kind: input, shape index: {}]   ;;  %s4390_s1 = inlined_call_operand.hbm [shape: bf16[768,640], index: 1, kind: input, shape index: {}]   ;;  %s4391_s2 = inlined_call_operand.vmem [shape: f32[1,640], index: 2, kind: input, shape index: {}]   ;;  %s4392_s3 = inlined_call_operand.vmem [shape: bf16[640,128], index: 3, kind: input, shape index: {}]   ;;  %s4393_s4 = inlined_call_operand.vmem [shape: f32[1,128], index: 4, kind: input, shape index: {}]   ;;  %s4394_s5 = inlined_call_operand.vmem [shape: f32[32,5], index: 5, kind: output, shape index: {0}]   ;;  %s4395_s6 = inlined_call_operand.hbm [shape: f32[32,128], index: 6, kind: output, shape index: {1}]  }
   0x1   :  { %13 = vsyncpa [#allocation5], 0  ;;  %s3928_s21 = smov [#allocation3]  }
   0x2   :  { %s21_s22 = sshll.u32 %s3928_s21, 4  ;;  %s22_s22 = int_to_ptr.vmem [resolvable:$true] %s21_s22 }
   0x3   :  { %s3892_s23 = scalar_lea.vmem %s22_s22, 30720  ;;  %p3897_p1 = scmp.lt.s32.totalorder %s22_s22, %s22_s22 }
   0x4   :  { %p3893_p0 = scmp.ne.s32.totalorder %s22_s22, %s3892_s23  ;;  %p3898_p2 = scmp.lt.s32.totalorder %s3892_s23, %s3892_s23 }
   0x6   :  { %p3899_p3 = por %p3898_p2, %p3897_p1 }
   0x8   :  { %p3900_p4 = pnand %p3899_p3, %p3893_p0 }
   0xa   :  { %3903 = shalt.err (!%p3900_p4)
}
   0xb   :  { %s3929_s24 = smov 320   ;;  %s3930_s25 = smov 20  }
   0xc   :  { %27 = dma.hbm_to_vmem [thread:$0]  %s4390_s1, 30720, %s22_s22, [#allocation4], %s3929_s24, %s3929_s24, %s3930_s25  }
   0xd   :  { %3924 = dma.done.wait [#allocation4], 30720  }
   0xe   :  { %3925 = vsyncadd [#allocation4], 4294936576  ;;  %v3481_v0 = vld [vmem:[#allocation3 + $0x11c] ss:$20 sps:$4 sm:$0xff]   ;;  %v3483_v1 = vld [vmem:[#allocation3 + $0x118] ss:$20 sps:$4 sm:$0xff]  }
   0xf   :  { %1673 = vmatprep.subr.bf16.mxu0 %v3481_v0  ;;  %v3484_v2 = vld [vmem:[#allocation3 + $0x39c] ss:$20 sps:$4 sm:$0xff]   ;;  %v3486_v3 = vld [vmem:[#allocation3 + $0x398] ss:$20 sps:$4 sm:$0xff]   ;;  %v3487_v4 = vld [vmem:[#allocation3 + $0xf4] ss:$20 sps:$4 sm:$0xff]  }
  0x10   :  { %1674 = vmatpush1.bf16.msra.mxu0 %v3483_v1  ;;  %v3489_v5 = vld [vmem:[#allocation3 + $0xf0] ss:$20 sps:$4 sm:$0xff]   ;;  %1726 = vmatprep.subr.bf16.mxu1 %v3484_v2  ;;  %v3490_v6 = vld [vmem:[#allocation3 + $0x374] ss:$20 sps:$4 sm:$0xff]   ;;  %v3493_v8 = vld [vmem:[#allocation3 + $0xcc] ss:$20 sps:$4 sm:$0xff]  }
  0x11   :  { %1727 = vmatpush1.bf16.msra.mxu1 %v3486_v3  ;;  %1675 = vmatprep.subr.bf16.mxu0 %v3487_v4  ;;  %v3492_v7 = vld [vmem:[#allocation3 + $0x370] ss:$20 sps:$4 sm:$0xff]   ;;  %v3495_v9 = vld [vmem:[#allocation3 + $0xc8] ss:$20 sps:$4 sm:$0xff]   ;;  %v3496_v10 = vld [vmem:[#allocation3 + $0x34c] ss:$20 sps:$4 sm:$0xff]  }
  0x12   :  { %1728 = vmatprep.subr.bf16.mxu1 %v3490_v6  ;;  %v3499_v11 = vld [vmem:[#allocation3 + $0xa4] ss:$20 sps:$4 sm:$0xff]   ;;  %v3498_v12 = vld [vmem:[#allocation3 + $0x348] ss:$20 sps:$4 sm:$0xff]   ;;  %v3501_v14 = vld [vmem:[#allocation3 + $0xa0] ss:$20 sps:$4 sm:$0xff]  }
  0x13   :  { %v3502_v13 = vld [vmem:[#allocation3 + $0x324] ss:$20 sps:$4 sm:$0xff]   ;;  %v3505_v15 = vld [vmem:[#allocation3 + $0x7c] ss:$20 sps:$4 sm:$0xff]   ;;  %v3504_v16 = vld [vmem:[#allocation3 + $0x320] ss:$20 sps:$4 sm:$0xff]  }
  0x14   :  { %1676 = vmatpush1.bf16.msra.mxu0 %v3489_v5  ;;  %v3508_v17 = vld [vmem:[#allocation3 + $0x2fc] ss:$20 sps:$4 sm:$0xff]   ;;  %v3507_v18 = vld [vmem:[#allocation3 + $0x78] ss:$20 sps:$4 sm:$0xff]   ;;  %v3511_v19 = vld [vmem:[#allocation3 + $0x54] ss:$20 sps:$4 sm:$0xff]  }
  0x15   :  { %1677 = vmatprep.subr.bf16.mxu0 %v3493_v8  ;;  %1729 = vmatpush1.bf16.msra.mxu1 %v3492_v7  ;;  %v3510_v20 = vld [vmem:[#allocation3 + $0x2f8] ss:$20 sps:$4 sm:$0xff]   ;;  %v3514_v21 = vld [vmem:[#allocation3 + $0x2d4] ss:$20 sps:$4 sm:$0xff]   ;;  %v3513_v22 = vld [vmem:[#allocation3 + $0x50] ss:$20 sps:$4 sm:$0xff]  }
  0x16   :  { %1730 = vmatprep.subr.bf16.mxu1 %v3496_v10  ;;  %v3517_v23 = vld [vmem:[#allocation3 + $0x2c] ss:$20 sps:$4 sm:$0xff]   ;;  %v3516_v24 = vld [vmem:[#allocation3 + $0x2d0] ss:$20 sps:$4 sm:$0xff]   ;;  %v3519_v26 = vld [vmem:[#allocation3 + $0x28] ss:$20 sps:$4 sm:$0xff]  }
  0x17   :  { %v3520_v25 = vld [vmem:[#allocation3 + $0x2ac] ss:$20 sps:$4 sm:$0xff]   ;;  %v3523_v27 = vld [vmem:[#allocation3 + $0x4] ss:$20 sps:$4 sm:$0xff]   ;;  %v3522_v28 = vld [vmem:[#allocation3 + $0x2a8] ss:$20 sps:$4 sm:$0xff]  }
  0x18   :  { %1678 = vmatpush1.bf16.msra.mxu0 %v3495_v9  ;;  %v3526_v29 = vld [vmem:[#allocation3 + $0x284] ss:$20 sps:$4 sm:$0xff]   ;;  %v3525_v30 = vld [vmem:[#allocation3] ss:$20 sps:$4 sm:$0xff]   ;;  %v3529_v31 = vld [vmem:[#allocation3 + $0x25c] ss:$20 sps:$4 sm:$0xff]  }
  0x19   :  { %1679 = vmatprep.subr.bf16.mxu0 %v3499_v11  ;;  %1731 = vmatpush1.bf16.msra.mxu1 %v3498_v12  ;;  %v3528_v32 = vld [vmem:[#allocation3 + $0x280] ss:$20 sps:$4 sm:$0xff]   ;;  %v3532_v33 = vld [vmem:[#allocation3 + $0x4dc] ss:$20 sps:$4 sm:$0xff]   ;;  %v3531_v34 = vld [vmem:[#allocation3 + $0x258] ss:$20 sps:$4 sm:$0xff]  }
  0x1a   :  { %1732 = vmatprep.subr.bf16.mxu1 %v3502_v13  ;;  %v3535_v35 = vld [vmem:[#allocation3 + $0x234] ss:$20 sps:$4 sm:$0xff]   ;;  %v3534_v36 = vld [vmem:[#allocation3 + $0x4d8] ss:$20 sps:$4 sm:$0xff]   ;;  %v3537_v38 = vld [vmem:[#allocation3 + $0x230] ss:$20 sps:$4 sm:$0xff]  }
  0x1b   :  { %v3538_v37 = vld [vmem:[#allocation3 + $0x4b4] ss:$20 sps:$4 sm:$0xff]   ;;  %v3541_v39 = vld [vmem:[#allocation3 + $0x20c] ss:$20 sps:$4 sm:$0xff]   ;;  %v3540_v40 = vld [vmem:[#allocation3 + $0x4b0] ss:$20 sps:$4 sm:$0xff]  }
  0x1c   :  { %1680 = vmatpush1.bf16.msra.mxu0 %v3501_v14  ;;  %v3544_v41 = vld [vmem:[#allocation3 + $0x48c] ss:$20 sps:$4 sm:$0xff]   ;;  %v3543_v42 = vld [vmem:[#allocation3 + $0x208] ss:$20 sps:$4 sm:$0xff]   ;;  %v3547_v43 = vld [vmem:[#allocation3 + $0x1e4] ss:$20 sps:$4 sm:$0xff]  }
  0x1d   :  { %1681 = vmatprep.subr.bf16.mxu0 %v3505_v15  ;;  %1733 = vmatpush1.bf16.msra.mxu1 %v3504_v16  ;;  %v3546_v44 = vld [vmem:[#allocation3 + $0x488] ss:$20 sps:$4 sm:$0xff]   ;;  %v3550_v45 = vld [vmem:[#allocation3 + $0x464] ss:$20 sps:$4 sm:$0xff]   ;;  %v3549_v46 = vld [vmem:[#allocation3 + $0x1e0] ss:$20 sps:$4 sm:$0xff]  }
  0x1e   :  { %1734 = vmatprep.subr.bf16.mxu1 %v3508_v17  ;;  %v3975_v47 = vld [vmem:[%s4389_s0 + $0x4] ss:$24 sps:$4 sm:$0xff]   ;;  %v3552_v49 = vld [vmem:[#allocation3 + $0x460] ss:$20 sps:$4 sm:$0xff]   ;;  %v3555_v52 = vld [vmem:[#allocation3 + $0x1b8] ss:$20 sps:$4 sm:$0xff]  }
  0x1f   :  { %v3553_v48 = vld [vmem:[#allocation3 + $0x1bc] ss:$20 sps:$4 sm:$0xff]   ;;  %1705 = vmatprep.mubr.bf16.mxu0 %v3975_v47  ;;  %v3981_v51 = vld [vmem:[%s4389_s0 + $0xc] ss:$24 sps:$4 sm:$0xff]   ;;  %v3559_v53 = vld [vmem:[#allocation3 + $0x194] ss:$20 sps:$4 sm:$0xff]  }
  0x20   :  { %1682 = vmatpush1.bf16.msra.mxu0 %v3507_v18  ;;  %v3556_v50 = vld [vmem:[#allocation3 + $0x43c] ss:$20 sps:$4 sm:$0xff]   ;;  %1758 = vmatprep.mubr.bf16.mxu1 %v3981_v51  ;;  %v3558_v54 = vld [vmem:[#allocation3 + $0x438] ss:$20 sps:$4 sm:$0xff]   ;;  %v3562_v55 = vld [vmem:[#allocation3 + $0x414] ss:$20 sps:$4 sm:$0xff]  }
  0x21   :  { %1683 = vmatprep.subr.bf16.mxu0 %v3511_v19  ;;  %1735 = vmatpush1.bf16.msra.mxu1 %v3510_v20  ;;  %v3561_v56 = vld [vmem:[#allocation3 + $0x190] ss:$20 sps:$4 sm:$0xff]   ;;  %v3565_v57 = vld [vmem:[#allocation3 + $0x16c] ss:$20 sps:$4 sm:$0xff]   ;;  %v3567_v60 = vld [vmem:[#allocation3 + $0x168] ss:$20 sps:$4 sm:$0xff]  }
  0x22   :  { %1736 = vmatprep.subr.bf16.mxu1 %v3514_v21  ;;  %v3564_v58 = vld [vmem:[#allocation3 + $0x410] ss:$20 sps:$4 sm:$0xff]   ;;  %v3568_v59 = vld [vmem:[#allocation3 + $0x3ec] ss:$20 sps:$4 sm:$0xff]   ;;  %v3570_v62 = vld [vmem:[#allocation3 + $0x3e8] ss:$20 sps:$4 sm:$0xff]  }
  0x23   :  { %v3571_v61 = vld [vmem:[#allocation3 + $0x144] ss:$20 sps:$4 sm:$0xff]   ;;  %v3573_v0 = vld [vmem:[#allocation3 + $0x140] ss:$20 sps:$4 sm:$0xff]   ;;  %v3582_v1 = vld [vmem:[#allocation3 + $0x61c] ss:$20 sps:$4 sm:$0xff]  }
  0x24   :  { %1684 = vmatpush1.bf16.msra.mxu0 %v3513_v22  ;;  %v3574_v63 = vld [vmem:[#allocation3 + $0x3c4] ss:$20 sps:$4 sm:$0xff]   ;;  %v3578_v2 = vld [vmem:[#allocation3 + $0x3c0] ss:$20 sps:$4 sm:$0xff]   ;;  %v3594_v9 = vld [vmem:[#allocation3 + $0xfc] ss:$20 sps:$4 sm:$0xff]  }
  0x25   :  { %1685 = vmatprep.subr.bf16.mxu0 %v3517_v23  ;;  %1737 = vmatpush1.bf16.msra.mxu1 %v3516_v24  ;;  %v3987_v3 = vld [vmem:[%s4389_s0] ss:$24 sps:$4 sm:$0xff]   ;;  %v3591_v7 = vld [vmem:[#allocation3 + $0x5f4] ss:$20 sps:$4 sm:$0xff]   ;;  %v3589_v10 = vld [vmem:[#allocation3 + $0x5f0] ss:$20 sps:$4 sm:$0xff]  }
  0x26   :  { %1738 = vmatprep.subr.bf16.mxu1 %v3520_v25  ;;  %v3588_v4 = vld [vmem:[#allocation3 + $0x124] ss:$20 sps:$4 sm:$0xff]   ;;  %v3585_v6 = vld [vmem:[%s4389_s0 + $0x8] ss:$24 sps:$4 sm:$0xff]   ;;  %v3609_v19 = vld [vmem:[#allocation3 + $0x57c] ss:$20 sps:$4 sm:$0xff]  }
  0x27   :  { %v3580_v5 = vld [vmem:[#allocation3 + $0x618] ss:$20 sps:$4 sm:$0xff]   ;;  %v3586_v8 = vld [vmem:[#allocation3 + $0x120] ss:$20 sps:$4 sm:$0xff]   ;;  %v3595_v14 = vld [vmem:[#allocation3 + $0x5c8] ss:$20 sps:$4 sm:$0xff]  }
  0x28   :  { %1686 = vmatpush1.bf16.msra.mxu0 %v3519_v26  ;;  %v3597_v11 = vld [vmem:[#allocation3 + $0x5cc] ss:$20 sps:$4 sm:$0xff]   ;;  %v3600_v13 = vld [vmem:[#allocation3 + $0xd4] ss:$20 sps:$4 sm:$0xff]   ;;  %v3603_v15 = vld [vmem:[#allocation3 + $0x5a4] ss:$20 sps:$4 sm:$0xff]  }
  0x29   :  { %1687 = vmatprep.subr.bf16.mxu0 %v3523_v27  ;;  %1739 = vmatpush1.bf16.msra.mxu1 %v3522_v28  ;;  %v3592_v12 = vld [vmem:[#allocation3 + $0xf8] ss:$20 sps:$4 sm:$0xff]   ;;  %v3598_v16 = vld [vmem:[#allocation3 + $0xd0] ss:$20 sps:$4 sm:$0xff]   ;;  %v3601_v18 = vld [vmem:[#allocation3 + $0x5a0] ss:$20 sps:$4 sm:$0xff]  }
  0x2a   :  { %1740 = vmatprep.subr.bf16.mxu1 %v3526_v29  ;;  %v3606_v17 = vld [vmem:[#allocation3 + $0xac] ss:$20 sps:$4 sm:$0xff]   ;;  %v3604_v20 = vld [vmem:[#allocation3 + $0xa8] ss:$20 sps:$4 sm:$0xff]   ;;  %v3612_v22 = vld [vmem:[#allocation3 + $0x84] ss:$20 sps:$4 sm:$0xff]  }
  0x2b   :  { %v3607_v21 = vld [vmem:[#allocation3 + $0x578] ss:$20 sps:$4 sm:$0xff]   ;;  %v3610_v23 = vld [vmem:[#allocation3 + $0x80] ss:$20 sps:$4 sm:$0xff]   ;;  %v3618_v26 = vld [vmem:[#allocation3 + $0x5c] ss:$20 sps:$4 sm:$0xff]  }
  0x2c   :  { %1688 = vmatpush1.bf16.msra.mxu0 %v3525_v30  ;;  %v3996_v24 = vld [vmem:[%s4389_s0 + $0x34] ss:$24 sps:$4 sm:$0xff]   ;;  %v4002_v27 = vld [vmem:[%s4389_s0 + $0x30] ss:$24 sps:$4 sm:$0xff]   ;;  %vm2198_vm0 = vcmask 1042432   ;;  %vm2278_vm1 = vcmask 1044480  }
  0x2d   :  { %1689 = vmatprep.subr.bf16.mxu0 %v3529_v31  ;;  %1741 = vmatpush1.bf16.msra.mxu1 %v3528_v32  ;;  %v3615_v25 = vld [vmem:[#allocation3 + $0x554] ss:$20 sps:$4 sm:$0xff]   ;;  %v3613_v29 = vld [vmem:[#allocation3 + $0x550] ss:$20 sps:$4 sm:$0xff]   ;;  %v3621_v31 = vld [vmem:[#allocation3 + $0x52c] ss:$20 sps:$4 sm:$0xff]  }
  0x2e   :  { %1742 = vmatprep.subr.bf16.mxu1 %v3532_v33  ;;  %v4007_v28 = vld [vmem:[%s4389_s0 + $0x3c] ss:$24 sps:$4 sm:$0xff]   ;;  %v4012_v30 = vld [vmem:[%s4389_s0 + $0x38] ss:$24 sps:$4 sm:$0xff]  }
  0x2f   :  { %v3616_v32 = vld [vmem:[#allocation3 + $0x58] ss:$20 sps:$4 sm:$0xff]   ;;  %v3624_v33 = vld [vmem:[#allocation3 + $0x34] ss:$20 sps:$4 sm:$0xff]  }
  0x30   :  { %1690 = vmatpush2.bf16.msra.mxu0 %v3531_v34  ;;  %v3619_v34 = vld [vmem:[#allocation3 + $0x528] ss:$20 sps:$4 sm:$0xff]  }
  0x31   :  { %1691 = vmatprep.subr.bf16.mxu0 %v3535_v35  ;;  %1743 = vmatpush2.bf16.msra.mxu1 %v3534_v36  ;;  %v3627_v35 = vld [vmem:[#allocation3 + $0x504] ss:$20 sps:$4 sm:$0xff]  }
  0x32   :  { %1744 = vmatprep.subr.bf16.mxu1 %v3538_v37  ;;  %v3622_v36 = vld [vmem:[#allocation3 + $0x30] ss:$20 sps:$4 sm:$0xff]   ;;  %v3630_v37 = vld [vmem:[#allocation3 + $0xc] ss:$20 sps:$4 sm:$0xff]  }
  0x34   :  { %1692 = vmatpush2.bf16.msra.mxu0 %v3537_v38  ;;  %v3625_v38 = vld [vmem:[#allocation3 + $0x500] ss:$20 sps:$4 sm:$0xff]  }
  0x35   :  { %1693 = vmatprep.subr.bf16.mxu0 %v3541_v39  ;;  %1745 = vmatpush2.bf16.msra.mxu1 %v3540_v40  ;;  %v4021_v39 = vld [vmem:[%s4389_s0 + $0x14] ss:$24 sps:$4 sm:$0xff]   ;;  %v3633_v40 = vld [vmem:[#allocation3 + $0x75c] ss:$20 sps:$4 sm:$0xff]  }
  0x36   :  { %1746 = vmatprep.subr.bf16.mxu1 %v3544_v41  ;;  %v3628_v41 = vld [vmem:[#allocation3 + $0x8] ss:$20 sps:$4 sm:$0xff]  }
  0x38   :  { %1694 = vmatpush2.bf16.msra.mxu0 %v3543_v42  ;;  %v3636_v42 = vld [vmem:[#allocation3 + $0x264] ss:$20 sps:$4 sm:$0xff]  }
  0x39   :  { %1695 = vmatprep.subr.bf16.mxu0 %v3547_v43  ;;  %1747 = vmatpush2.bf16.msra.mxu1 %v3546_v44  ;;  %v3631_v43 = vld [vmem:[#allocation3 + $0x758] ss:$20 sps:$4 sm:$0xff]   ;;  %v3639_v44 = vld [vmem:[#allocation3 + $0x734] ss:$20 sps:$4 sm:$0xff]  }
  0x3a   :  { %1748 = vmatprep.subr.bf16.mxu1 %v3550_v45  ;;  %v3634_v45 = vld [vmem:[#allocation3 + $0x260] ss:$20 sps:$4 sm:$0xff]  }
  0x3c   :  { %1696 = vmatpush2.bf16.msra.mxu0 %v3549_v46  ;;  %v3642_v46 = vld [vmem:[#allocation3 + $0x23c] ss:$20 sps:$4 sm:$0xff]  }
  0x3d   :  { %1697 = vmatprep.subr.bf16.mxu0 %v3553_v48  ;;  %1749 = vmatpush2.bf16.msra.mxu1 %v3552_v49  ;;  %v3645_v48 = vld [vmem:[#allocation3 + $0x70c] ss:$20 sps:$4 sm:$0xff]  }
  0x3e   :  { %1750 = vmatprep.subr.bf16.mxu1 %v3556_v50  ;;  %v3640_v49 = vld [vmem:[#allocation3 + $0x238] ss:$20 sps:$4 sm:$0xff]   ;;  %v3648_v50 = vld [vmem:[#allocation3 + $0x214] ss:$20 sps:$4 sm:$0xff]  }
  0x40   :  { %1698 = vmatpush2.bf16.msra.mxu0 %v3555_v52  ;;  %v3643_v52 = vld [vmem:[#allocation3 + $0x708] ss:$20 sps:$4 sm:$0xff]  }
  0x41   :  { %1699 = vmatprep.subr.bf16.mxu0 %v3559_v53  ;;  %1751 = vmatpush2.bf16.msra.mxu1 %v3558_v54  ;;  %v3651_v53 = vld [vmem:[#allocation3 + $0x6e4] ss:$20 sps:$4 sm:$0xff]  }
  0x42   :  { %1752 = vmatprep.subr.bf16.mxu1 %v3562_v55  ;;  %v3646_v54 = vld [vmem:[#allocation3 + $0x210] ss:$20 sps:$4 sm:$0xff]   ;;  %v3654_v55 = vld [vmem:[#allocation3 + $0x1ec] ss:$20 sps:$4 sm:$0xff]  }
  0x44   :  { %1700 = vmatpush2.bf16.msra.mxu0 %v3561_v56  ;;  %v3649_v56 = vld [vmem:[#allocation3 + $0x6e0] ss:$20 sps:$4 sm:$0xff]  }
  0x45   :  { %1701 = vmatprep.subr.bf16.mxu0 %v3565_v57  ;;  %1753 = vmatpush2.bf16.msra.mxu1 %v3564_v58  ;;  %v3657_v57 = vld [vmem:[#allocation3 + $0x6bc] ss:$20 sps:$4 sm:$0xff]  }
  0x46   :  { %1754 = vmatprep.subr.bf16.mxu1 %v3568_v59  ;;  %v3652_v58 = vld [vmem:[#allocation3 + $0x1e8] ss:$20 sps:$4 sm:$0xff]   ;;  %v3662_v59 = vld [vmem:[#allocation3 + $0x1c4] ss:$20 sps:$4 sm:$0xff]  }
  0x48   :  { %1702 = vmatpush2.bf16.msra.mxu0 %v3567_v60  ;;  %v3655_v60 = vld [vmem:[#allocation3 + $0x6b8] ss:$20 sps:$4 sm:$0xff]  }
  0x49   :  { %1703 = vmatprep.subr.bf16.mxu0 %v3571_v61  ;;  %1755 = vmatpush2.bf16.msra.mxu1 %v3570_v62  ;;  %v3668_v61 = vld [vmem:[#allocation3 + $0x694] ss:$20 sps:$4 sm:$0xff]  }
  0x4a   :  { %1756 = vmatprep.subr.bf16.mxu1 %v3574_v63  ;;  %v3660_v62 = vld [vmem:[#allocation3 + $0x1c0] ss:$20 sps:$4 sm:$0xff]   ;;  %v3672_v63 = vld [vmem:[#allocation3 + $0x19c] ss:$20 sps:$4 sm:$0xff]  }
  0x4c   :  { %1704 = vmatpush2.bf16.msra.mxu0 %v3573_v0  ;;  %v3666_v0 = vld [vmem:[#allocation3 + $0x690] ss:$20 sps:$4 sm:$0xff]  }
  0x4d   :  { %1779 = vmatprep.subr.bf16.mxu0 %v3582_v1  ;;  %1757 = vmatpush2.bf16.msra.mxu1 %v3578_v2  ;;  %v3675_v1 = vld [vmem:[#allocation3 + $0x66c] ss:$20 sps:$4 sm:$0xff]  }
  0x4e   :  { %1832 = vmatprep.subr.bf16.mxu1 %v3588_v4  ;;  %v3670_v2 = vld [vmem:[#allocation3 + $0x198] ss:$20 sps:$4 sm:$0xff]   ;;  %v3678_v4 = vld [vmem:[#allocation3 + $0x174] ss:$20 sps:$4 sm:$0xff]  }
  0x4f   :  { %1706 = vmatmul.mubr.bf16.vlgmr.msra.gmra.mxu0 %v3987_v3 }
  0x50   :  { %1780 = vmatpush1.bf16.msra.mxu0 %v3580_v5  ;;  %1759 = vmatmul.mubr.bf16.vlgmr.msra.gmra.mxu1 %v3585_v6  ;;  %v3673_v5 = vld [vmem:[#allocation3 + $0x668] ss:$20 sps:$4 sm:$0xff]   ;;  %v3681_v6 = vld [vmem:[#allocation3 + $0x644] ss:$20 sps:$4 sm:$0xff]  }
  0x51   :  { %1781 = vmatprep.subr.bf16.mxu0 %v3591_v7  ;;  %1833 = vmatpush1.bf16.msra.mxu1 %v3586_v8  ;;  %v3676_v7 = vld [vmem:[#allocation3 + $0x170] ss:$20 sps:$4 sm:$0xff]   ;;  %v3684_v8 = vld [vmem:[#allocation3 + $0x14c] ss:$20 sps:$4 sm:$0xff]  }
  0x52   :  { %1834 = vmatprep.subr.bf16.mxu1 %v3594_v9  ;;  %1715 = vmatprep.mubr.bf16.mxu0 %v3996_v24  ;;  %v3679_v9 = vld [vmem:[#allocation3 + $0x640] ss:$20 sps:$4 sm:$0xff]  }
  0x53   :  { %1768 = vmatprep.mubr.bf16.mxu1 %v4007_v28 }
  0x54   :  { %1782 = vmatpush1.bf16.msra.mxu0 %v3589_v10  ;;  %v3690_v10 = vld [vmem:[#allocation3 + $0x3a4] ss:$20 sps:$4 sm:$0xff]  }
  0x55   :  { %1783 = vmatprep.subr.bf16.mxu0 %v3597_v11  ;;  %1835 = vmatpush1.bf16.msra.mxu1 %v3592_v12  ;;  %v3682_v11 = vld [vmem:[#allocation3 + $0x148] ss:$20 sps:$4 sm:$0xff]  }
  0x56   :  { %1836 = vmatprep.subr.bf16.mxu1 %v3600_v13  ;;  %v4027_v12 = vld [vmem:[%s4389_s0 + $0x10] ss:$24 sps:$4 sm:$0xff]   ;;  %v3693_v13 = vld [vmem:[#allocation3 + $0x624] ss:$20 sps:$4 sm:$0xff]  }
  0x57   :  { %1716 = vmatmul.mubr.bf16.gmra.mxu0 %v4002_v27 }
  0x58   :  { %1784 = vmatpush1.bf16.msra.mxu0 %v3595_v14  ;;  %1769 = vmatmul.mubr.bf16.gmra.mxu1 %v4012_v30  ;;  %v3688_v14 = vld [vmem:[#allocation3 + $0x3a0] ss:$20 sps:$4 sm:$0xff]  }
  0x59   :  { %1785 = vmatprep.subr.bf16.mxu0 %v3603_v15  ;;  %1837 = vmatpush1.bf16.msra.mxu1 %v3598_v16  ;;  %v4032_v15 = vld [vmem:[%s4389_s0 + $0x44] ss:$24 sps:$4 sm:$0xff]  }
  0x5a   :  { %1838 = vmatprep.subr.bf16.mxu1 %v3606_v17  ;;  %1864 = vmatprep.mubr.bf16.mxu1 %v3975_v47  ;;  %v3637_v47 = vld [vmem:[#allocation3 + $0x730] ss:$20 sps:$4 sm:$0xff]   ;;  %v3691_v17 = vld [vmem:[#allocation3 + $0x620] ss:$20 sps:$4 sm:$0xff]  }
  0x5b   :  { %1811 = vmatprep.mubr.bf16.mxu0 %v4021_v39  ;;  %v3696_v16 = vld [vmem:[#allocation3 + $0x37c] ss:$20 sps:$4 sm:$0xff]  }
  0x5c   :  { %1786 = vmatpush1.bf16.msra.mxu0 %v3601_v18  ;;  %v3699_v18 = vld [vmem:[#allocation3 + $0x5fc] ss:$20 sps:$4 sm:$0xff]  }
  0x5d   :  { %1787 = vmatprep.subr.bf16.mxu0 %v3609_v19  ;;  %1839 = vmatpush1.bf16.msra.mxu1 %v3604_v20  ;;  %v3694_v19 = vld [vmem:[#allocation3 + $0x378] ss:$20 sps:$4 sm:$0xff]   ;;  %v3705_v20 = vld [vmem:[#allocation3 + $0x354] ss:$20 sps:$4 sm:$0xff]  }
  0x5e   :  { %1840 = vmatprep.subr.bf16.mxu1 %v3612_v22  ;;  %v4041_v22 = vld [vmem:[%s4389_s0 + $0x40] ss:$24 sps:$4 sm:$0xff]  }
  0x60   :  { %1788 = vmatpush1.bf16.msra.mxu0 %v3607_v21  ;;  %v3697_v21 = vld [vmem:[#allocation3 + $0x5f8] ss:$20 sps:$4 sm:$0xff]  }
  0x61   :  { %1789 = vmatprep.subr.bf16.mxu0 %v3615_v25  ;;  %1841 = vmatpush1.bf16.msra.mxu1 %v3610_v23  ;;  %v3708_v23 = vld [vmem:[#allocation3 + $0x5d4] ss:$20 sps:$4 sm:$0xff]   ;;  %v3703_v25 = vld [vmem:[#allocation3 + $0x350] ss:$20 sps:$4 sm:$0xff]  }
  0x62   :  { %1842 = vmatprep.subr.bf16.mxu1 %v3618_v26  ;;  %v3706_v26 = vld [vmem:[#allocation3 + $0x5d0] ss:$20 sps:$4 sm:$0xff]  }
  0x64   :  { %1790 = vmatpush1.bf16.msra.mxu0 %v3613_v29  ;;  %v3711_v29 = vld [vmem:[#allocation3 + $0x32c] ss:$20 sps:$4 sm:$0xff]  }
  0x65   :  { %1791 = vmatprep.subr.bf16.mxu0 %v3621_v31  ;;  %1843 = vmatpush1.bf16.msra.mxu1 %v3616_v32  ;;  %v3714_v31 = vld [vmem:[#allocation3 + $0x5ac] ss:$20 sps:$4 sm:$0xff]   ;;  %v3717_v32 = vld [vmem:[#allocation3 + $0x304] ss:$20 sps:$4 sm:$0xff]  }
  0x66   :  { %1844 = vmatprep.subr.bf16.mxu1 %v3624_v33  ;;  %v3715_v33 = vld [vmem:[#allocation3 + $0x300] ss:$20 sps:$4 sm:$0xff]  }
  0x68   :  { %1792 = vmatpush1.bf16.msra.mxu0 %v3619_v34  ;;  %v3720_v34 = vld [vmem:[#allocation3 + $0x584] ss:$20 sps:$4 sm:$0xff]  }
  0x69   :  { %1793 = vmatprep.subr.bf16.mxu0 %v3627_v35  ;;  %1845 = vmatpush1.bf16.msra.mxu1 %v3622_v36  ;;  %v3718_v35 = vld [vmem:[#allocation3 + $0x580] ss:$20 sps:$4 sm:$0xff]   ;;  %v3723_v36 = vld [vmem:[#allocation3 + $0x2dc] ss:$20 sps:$4 sm:$0xff]  }
  0x6a   :  { %1846 = vmatprep.subr.bf16.mxu1 %v3630_v37  ;;  %v3721_v37 = vld [vmem:[#allocation3 + $0x2d8] ss:$20 sps:$4 sm:$0xff]  }
  0x6c   :  { %1794 = vmatpush1.bf16.msra.mxu0 %v3625_v38  ;;  %v3726_v38 = vld [vmem:[#allocation3 + $0x55c] ss:$20 sps:$4 sm:$0xff]  }
  0x6d   :  { %1795 = vmatprep.subr.bf16.mxu0 %v3633_v40  ;;  %1847 = vmatpush1.bf16.msra.mxu1 %v3628_v41  ;;  %v3729_v40 = vld [vmem:[#allocation3 + $0x2b4] ss:$20 sps:$4 sm:$0xff]  }
  0x6e   :  { %1848 = vmatprep.subr.bf16.mxu1 %v3636_v42  ;;  %v3732_v41 = vld [vmem:[#allocation3 + $0x534] ss:$20 sps:$4 sm:$0xff]   ;;  %v3735_v42 = vld [vmem:[#allocation3 + $0x28c] ss:$20 sps:$4 sm:$0xff]  }
  0x70   :  { %1796 = vmatpush2.bf16.msra.mxu0 %v3631_v43  ;;  %v3733_v43 = vld [vmem:[#allocation3 + $0x288] ss:$20 sps:$4 sm:$0xff]  }
  0x71   :  { %1797 = vmatprep.subr.bf16.mxu0 %v3639_v44  ;;  %1849 = vmatpush2.bf16.msra.mxu1 %v3634_v45  ;;  %v3738_v44 = vld [vmem:[#allocation3 + $0x50c] ss:$20 sps:$4 sm:$0xff]   ;;  %v3736_v45 = vld [vmem:[#allocation3 + $0x508] ss:$20 sps:$4 sm:$0xff]  }
  0x72   :  { %1850 = vmatprep.subr.bf16.mxu1 %v3642_v46  ;;  %v3741_v46 = vld [vmem:[#allocation3 + $0x4e4] ss:$20 sps:$4 sm:$0xff]  }
  0x74   :  { %1798 = vmatpush2.bf16.msra.mxu0 %v3637_v47  ;;  %v3739_v47 = vld [vmem:[#allocation3 + $0x4e0] ss:$20 sps:$4 sm:$0xff]  }
  0x75   :  { %1799 = vmatprep.subr.bf16.mxu0 %v3645_v48  ;;  %1851 = vmatpush2.bf16.msra.mxu1 %v3640_v49  ;;  %v3744_v48 = vld [vmem:[#allocation3 + $0x764] ss:$20 sps:$4 sm:$0xff]   ;;  %v3742_v49 = vld [vmem:[#allocation3 + $0x760] ss:$20 sps:$4 sm:$0xff]  }
  0x76   :  { %1852 = vmatprep.subr.bf16.mxu1 %v3648_v50  ;;  %v3747_v50 = vld [vmem:[#allocation3 + $0x4bc] ss:$20 sps:$4 sm:$0xff]  }
  0x78   :  { %1800 = vmatpush2.bf16.msra.mxu0 %v3643_v52  ;;  %v3745_v52 = vld [vmem:[#allocation3 + $0x4b8] ss:$20 sps:$4 sm:$0xff]  }
  0x79   :  { %1801 = vmatprep.subr.bf16.mxu0 %v3651_v53  ;;  %1853 = vmatpush2.bf16.msra.mxu1 %v3646_v54  ;;  %v3750_v53 = vld [vmem:[#allocation3 + $0x73c] ss:$20 sps:$4 sm:$0xff]   ;;  %v3748_v54 = vld [vmem:[#allocation3 + $0x738] ss:$20 sps:$4 sm:$0xff]  }
  0x7a   :  { %1854 = vmatprep.subr.bf16.mxu1 %v3654_v55  ;;  %v3753_v55 = vld [vmem:[#allocation3 + $0x494] ss:$20 sps:$4 sm:$0xff]  }
  0x7c   :  { %1802 = vmatpush2.bf16.msra.mxu0 %v3649_v56  ;;  %v3751_v56 = vld [vmem:[#allocation3 + $0x490] ss:$20 sps:$4 sm:$0xff]  }
  0x7d   :  { %1803 = vmatprep.subr.bf16.mxu0 %v3657_v57  ;;  %1855 = vmatpush2.bf16.msra.mxu1 %v3652_v58  ;;  %v3756_v57 = vld [vmem:[#allocation3 + $0x714] ss:$20 sps:$4 sm:$0xff]   ;;  %v3754_v58 = vld [vmem:[#allocation3 + $0x710] ss:$20 sps:$4 sm:$0xff]  }
  0x7e   :  { %1856 = vmatprep.subr.bf16.mxu1 %v3662_v59  ;;  %v3759_v59 = vld [vmem:[#allocation3 + $0x46c] ss:$20 sps:$4 sm:$0xff]  }
  0x80   :  { %1804 = vmatpush2.bf16.msra.mxu0 %v3655_v60  ;;  %v3757_v60 = vld [vmem:[#allocation3 + $0x468] ss:$20 sps:$4 sm:$0xff]  }
  0x81   :  { %1805 = vmatprep.subr.bf16.mxu0 %v3668_v61  ;;  %1857 = vmatpush2.bf16.msra.mxu1 %v3660_v62  ;;  %v3762_v61 = vld [vmem:[#allocation3 + $0x6ec] ss:$20 sps:$4 sm:$0xff]   ;;  %v3760_v62 = vld [vmem:[#allocation3 + $0x6e8] ss:$20 sps:$4 sm:$0xff]  }
  0x82   :  { %1858 = vmatprep.subr.bf16.mxu1 %v3672_v63  ;;  %v3765_v63 = vld [vmem:[#allocation3 + $0x444] ss:$20 sps:$4 sm:$0xff]  }
  0x84   :  { %1806 = vmatpush2.bf16.msra.mxu0 %v3666_v0  ;;  %v3763_v0 = vld [vmem:[#allocation3 + $0x440] ss:$20 sps:$4 sm:$0xff]  }
  0x85   :  { %1807 = vmatprep.subr.bf16.mxu0 %v3675_v1  ;;  %1859 = vmatpush2.bf16.msra.mxu1 %v3670_v2  ;;  %v3768_v1 = vld [vmem:[#allocation3 + $0x6c4] ss:$20 sps:$4 sm:$0xff]   ;;  %v3766_v2 = vld [vmem:[#allocation3 + $0x6c0] ss:$20 sps:$4 sm:$0xff]  }
  0x86   :  { %1860 = vmatprep.subr.bf16.mxu1 %v3678_v4  ;;  %v3771_v4 = vld [vmem:[#allocation3 + $0x41c] ss:$20 sps:$4 sm:$0xff]  }
  0x88   :  { %1808 = vmatpush2.bf16.msra.mxu0 %v3673_v5  ;;  %v3769_v5 = vld [vmem:[#allocation3 + $0x418] ss:$20 sps:$4 sm:$0xff]  }
  0x89   :  { %1809 = vmatprep.subr.bf16.mxu0 %v3681_v6  ;;  %1861 = vmatpush2.bf16.msra.mxu1 %v3676_v7  ;;  %v3774_v6 = vld [vmem:[#allocation3 + $0x69c] ss:$20 sps:$4 sm:$0xff]   ;;  %v3772_v7 = vld [vmem:[#allocation3 + $0x698] ss:$20 sps:$4 sm:$0xff]  }
  0x8a   :  { %1862 = vmatprep.subr.bf16.mxu1 %v3684_v8  ;;  %v3777_v8 = vld [vmem:[#allocation3 + $0x3f4] ss:$20 sps:$4 sm:$0xff]  }
  0x8c   :  { %1810 = vmatpush2.bf16.msra.mxu0 %v3679_v9  ;;  %v3775_v9 = vld [vmem:[#allocation3 + $0x3f0] ss:$20 sps:$4 sm:$0xff]  }
  0x8d   :  { %1885 = vmatprep.subr.bf16.mxu0 %v3690_v10  ;;  %1863 = vmatpush2.bf16.msra.mxu1 %v3682_v11  ;;  %v3780_v10 = vld [vmem:[#allocation3 + $0x674] ss:$20 sps:$4 sm:$0xff]   ;;  %v3778_v11 = vld [vmem:[#allocation3 + $0x670] ss:$20 sps:$4 sm:$0xff]  }
  0x8e   :  { %1938 = vmatprep.subr.bf16.mxu1 %v3693_v13  ;;  %v3783_v13 = vld [vmem:[#allocation3 + $0x3cc] ss:$20 sps:$4 sm:$0xff]  }
  0x8f   :  { %1812 = vmatmul.mubr.bf16.vlgmr.msra.gmra.mxu0 %v4027_v12 }
  0x90   :  { %1886 = vmatpush1.bf16.msra.mxu0 %v3688_v14  ;;  %1821 = vmatprep.mubr.bf16.mxu0 %v4032_v15  ;;  %v3786_v14 = vld [vmem:[#allocation3 + $0x64c] ss:$20 sps:$4 sm:$0xff]  }
  0x91   :  { %1865 = vmatmul.mubr.bf16.vlgmr.msra.gmra.mxu1 %v3987_v3  ;;  %1887 = vmatprep.subr.bf16.mxu0 %v3696_v16  ;;  %v3709_v3 = vld [vmem:[#allocation3 + $0x328] ss:$20 sps:$4 sm:$0xff]  }
  0x92   :  { %1939 = vmatpush1.bf16.msra.mxu1 %v3691_v17  ;;  %1874 = vmatprep.mubr.bf16.mxu1 %v3996_v24  ;;  %v3712_v24 = vld [vmem:[#allocation3 + $0x5a8] ss:$20 sps:$4 sm:$0xff]  }
  0x93   :  { %1940 = vmatprep.subr.bf16.mxu1 %v3699_v18  ;;  %v3781_v16 = vld [vmem:[#allocation3 + $0x3c8] ss:$20 sps:$4 sm:$0xff]  }
  0x94   :  { %1888 = vmatpush1.bf16.msra.mxu0 %v3694_v19  ;;  %v3787_v17 = vld [vmem:[#allocation3 + $0x268] ss:$20 sps:$4 sm:$0xff]  }
  0x95   :  { %1889 = vmatprep.subr.bf16.mxu0 %v3705_v20  ;;  %v3784_v18 = vld [vmem:[#allocation3 + $0x648] ss:$20 sps:$4 sm:$0xff]  }
  0x96   :  { %1941 = vmatpush1.bf16.msra.mxu1 %v3697_v21  ;;  %v3789_v19 = vld [vmem:[#allocation3 + $0x4e8] ss:$20 sps:$4 sm:$0xff]   ;;  %v3791_v21 = vld [vmem:[#allocation3 + $0x240] ss:$20 sps:$4 sm:$0xff]  }
  0x97   :  { %1822 = vmatmul.mubr.bf16.gmra.mxu0 %v4041_v22  ;;  %1942 = vmatprep.subr.bf16.mxu1 %v3708_v23  ;;  %v3788_v20 = vld [vmem:[#allocation3 + $0x128] ss:$20 sps:$4 sm:$0xff]  }
  0x98   :  { %1890 = vmatpush1.bf16.msra.mxu0 %v3703_v25  ;;  %1917 = vmatprep.mubr.bf16.mxu0 %v3981_v51  ;;  %v3724_v51 = vld [vmem:[#allocation3 + $0x558] ss:$20 sps:$4 sm:$0xff]   ;;  %v3790_v23 = vld [vmem:[#allocation3 + $0x3a8] ss:$20 sps:$4 sm:$0xff]   ;;  %v3793_v25 = vld [vmem:[#allocation3 + $0x4c0] ss:$20 sps:$4 sm:$0xff]  }
  0x99   :  { %1891 = vmatprep.subr.bf16.mxu0 %v3711_v29  ;;  %1875 = vmatmul.mubr.bf16.gmra.mxu1 %v4002_v27  ;;  %v3727_v27 = vld [vmem:[#allocation3 + $0x2b0] ss:$20 sps:$4 sm:$0xff]   ;;  %v4050_v29 = vld [vmem:[%s4389_s0 + $0x8] ss:$24 sps:$4 sm:$0xff]  }
  0x9a   :  { %1943 = vmatpush1.bf16.msra.mxu1 %v3706_v26  ;;  %1970 = vmatprep.mubr.bf16.mxu1 %v4021_v39  ;;  %v3730_v39 = vld [vmem:[#allocation3 + $0x530] ss:$20 sps:$4 sm:$0xff]   ;;  %v3792_v26 = vld [vmem:[#allocation3 + $0x100] ss:$20 sps:$4 sm:$0xff]  }
  0x9b   :  { %1944 = vmatprep.subr.bf16.mxu1 %v3714_v31  ;;  %v3794_v31 = vld [vmem:[#allocation3 + $0x380] ss:$20 sps:$4 sm:$0xff]  }
  0x9c   :  { %1892 = vmatpush1.bf16.msra.mxu0 %v3709_v3  ;;  %v3795_v3 = vld [vmem:[#allocation3 + $0x218] ss:$20 sps:$4 sm:$0xff]  }
  0x9d   :  { %1893 = vmatprep.subr.bf16.mxu0 %v3717_v32  ;;  %v3796_v32 = vld [vmem:[#allocation3 + $0xd8] ss:$20 sps:$4 sm:$0xff]  }
  0x9e   :  { %1945 = vmatpush1.bf16.msra.mxu1 %v3712_v24  ;;  %v3797_v24 = vld [vmem:[#allocation3 + $0x498] ss:$20 sps:$4 sm:$0xff]  }
  0x9f   :  { %1946 = vmatprep.subr.bf16.mxu1 %v3720_v34  ;;  %v3798_v34 = vld [vmem:[#allocation3 + $0x358] ss:$20 sps:$4 sm:$0xff]  }
  0xa0   :  { %1894 = vmatpush1.bf16.msra.mxu0 %v3715_v33  ;;  %v3799_v33 = vld [vmem:[#allocation3 + $0x1f0] ss:$20 sps:$4 sm:$0xff]  }
  0xa1   :  { %1895 = vmatprep.subr.bf16.mxu0 %v3723_v36  ;;  %v3801_v36 = vld [vmem:[#allocation3 + $0x470] ss:$20 sps:$4 sm:$0xff]  }
  0xa2   :  { %1947 = vmatpush1.bf16.msra.mxu1 %v3718_v35  ;;  %v3800_v35 = vld [vmem:[#allocation3 + $0xb0] ss:$20 sps:$4 sm:$0xff]  }
  0xa3   :  { %1948 = vmatprep.subr.bf16.mxu1 %v3726_v38  ;;  %v3876_v38 = vld [vmem:[%s4389_s0 + $0x4] ss:$24 sps:$4 sm:$0xff]  }
  0xa4   :  { %1896 = vmatpush1.bf16.msra.mxu0 %v3721_v37  ;;  %v3802_v37 = vld [vmem:[#allocation3 + $0x330] ss:$20 sps:$4 sm:$0xff]  }
  0xa5   :  { %1897 = vmatprep.subr.bf16.mxu0 %v3729_v40  ;;  %v3804_v40 = vld [vmem:[#allocation3 + $0x88] ss:$20 sps:$4 sm:$0xff]  }
  0xa6   :  { %1949 = vmatpush1.bf16.msra.mxu1 %v3724_v51  ;;  %v3805_v51 = vld [vmem:[#allocation3 + $0x448] ss:$20 sps:$4 sm:$0xff]  }
  0xa7   :  { %1950 = vmatprep.subr.bf16.mxu1 %v3732_v41  ;;  %v3806_v41 = vld [vmem:[#allocation3 + $0x308] ss:$20 sps:$4 sm:$0xff]  }
  0xa8   :  { %1898 = vmatpush1.bf16.msra.mxu0 %v3727_v27  ;;  %v3877_v27 = vld [vmem:[%s4389_s0 + $0xc] ss:$24 sps:$4 sm:$0xff]  }
  0xa9   :  { %1899 = vmatprep.subr.bf16.mxu0 %v3735_v42  ;;  %v3808_v42 = vld [vmem:[#allocation3 + $0x60] ss:$20 sps:$4 sm:$0xff]  }
  0xaa   :  { %1951 = vmatpush1.bf16.msra.mxu1 %v3730_v39  ;;  %v3809_v39 = vld [vmem:[#allocation3 + $0x420] ss:$20 sps:$4 sm:$0xff]  }
  0xab   :  { %1952 = vmatprep.subr.bf16.mxu1 %v3738_v44  ;;  %v3810_v44 = vld [vmem:[#allocation3 + $0x2e0] ss:$20 sps:$4 sm:$0xff]  }
  0xac   :  { %1900 = vmatpush1.bf16.msra.mxu0 %v3733_v43  ;;  %v3811_v43 = vld [vmem:[#allocation3 + $0x178] ss:$20 sps:$4 sm:$0xff]  }
  0xad   :  { %1901 = vmatprep.subr.bf16.mxu0 %v3741_v46  ;;  %v3812_v46 = vld [vmem:[#allocation3 + $0x38] ss:$20 sps:$4 sm:$0xff]  }
  0xae   :  { %1953 = vmatpush1.bf16.msra.mxu1 %v3736_v45  ;;  %v3813_v45 = vld [vmem:[#allocation3 + $0x3f8] ss:$20 sps:$4 sm:$0xff]  }
  0xaf   :  { %1954 = vmatprep.subr.bf16.mxu1 %v3744_v48  ;;  %v3814_v48 = vld [vmem:[#allocation3 + $0x2b8] ss:$20 sps:$4 sm:$0xff]  }
  0xb0   :  { %1902 = vmatpush2.bf16.msra.mxu0 %v3739_v47  ;;  %v3815_v47 = vld [vmem:[#allocation3 + $0x150] ss:$20 sps:$4 sm:$0xff]  }
  0xb1   :  { %1903 = vmatprep.subr.bf16.mxu0 %v3747_v50  ;;  %v3816_v50 = vld [vmem:[#allocation3 + $0x10] ss:$20 sps:$4 sm:$0xff]  }
  0xb2   :  { %1955 = vmatpush2.bf16.msra.mxu1 %v3742_v49  ;;  %v3817_v49 = vld [vmem:[#allocation3 + $0x3d0] ss:$20 sps:$4 sm:$0xff]  }
  0xb3   :  { %1956 = vmatprep.subr.bf16.mxu1 %v3750_v53  ;;  %v3818_v53 = vld [vmem:[#allocation3 + $0x290] ss:$20 sps:$4 sm:$0xff]  }
  0xb4   :  { %1904 = vmatpush2.bf16.msra.mxu0 %v3745_v52  ;;  %v3819_v52 = vld [vmem:[#allocation3 + $0x768] ss:$20 sps:$4 sm:$0xff]  }
  0xb5   :  { %1905 = vmatprep.subr.bf16.mxu0 %v3753_v55  ;;  %v3821_v55 = vld [vmem:[#allocation3 + $0x740] ss:$20 sps:$4 sm:$0xff]  }
  0xb6   :  { %1957 = vmatpush2.bf16.msra.mxu1 %v3748_v54  ;;  %v3820_v54 = vld [vmem:[#allocation3 + $0x628] ss:$20 sps:$4 sm:$0xff]  }
  0xb7   :  { %1958 = vmatprep.subr.bf16.mxu1 %v3756_v57  ;;  %v3822_v57 = vld [vmem:[#allocation3 + $0x600] ss:$20 sps:$4 sm:$0xff]  }
  0xb8   :  { %1906 = vmatpush2.bf16.msra.mxu0 %v3751_v56  ;;  %v3878_v56 = vld [vmem:[%s4389_s0] ss:$24 sps:$4 sm:$0xff]  }
  0xb9   :  { %1907 = vmatprep.subr.bf16.mxu0 %v3759_v59  ;;  %v3823_v59 = vld [vmem:[#allocation3 + $0x718] ss:$20 sps:$4 sm:$0xff]  }
  0xba   :  { %1959 = vmatpush2.bf16.msra.mxu1 %v3754_v58  ;;  %v3879_v58 = vld [vmem:[%s4389_s0 + $0x34] ss:$24 sps:$4 sm:$0xff]  }
  0xbb   :  { %1960 = vmatprep.subr.bf16.mxu1 %v3762_v61  ;;  %v3824_v61 = vld [vmem:[#allocation3 + $0x5d8] ss:$20 sps:$4 sm:$0xff]  }
  0xbc   :  { %1908 = vmatpush2.bf16.msra.mxu0 %v3757_v60  ;;  %v3880_v60 = vld [vmem:[%s4389_s0 + $0x3c] ss:$24 sps:$4 sm:$0xff]  }
  0xbd   :  { %1909 = vmatprep.subr.bf16.mxu0 %v3765_v63  ;;  %v3881_v63 = vld [vmem:[%s4389_s0 + $0x30] ss:$24 sps:$4 sm:$0xff]  }
  0xbe   :  { %1961 = vmatpush2.bf16.msra.mxu1 %v3760_v62  ;;  %v3825_v62 = vld [vmem:[#allocation3 + $0x6f0] ss:$20 sps:$4 sm:$0xff]  }
  0xbf   :  { %1962 = vmatprep.subr.bf16.mxu1 %v3768_v1  ;;  %v3882_v1 = vld [vmem:[%s4389_s0 + $0x14] ss:$24 sps:$4 sm:$0xff]  }
  0xc0   :  { %1910 = vmatpush2.bf16.msra.mxu0 %v3763_v0  ;;  %v3826_v0 = vld [vmem:[#allocation3 + $0x5b0] ss:$20 sps:$4 sm:$0xff]  }
  0xc1   :  { %1911 = vmatprep.subr.bf16.mxu0 %v3771_v4  ;;  %v3883_v4 = vld [vmem:[%s4389_s0 + $0x38] ss:$24 sps:$4 sm:$0xff]  }
  0xc2   :  { %1963 = vmatpush2.bf16.msra.mxu1 %v3766_v2  ;;  %v3827_v2 = vld [vmem:[#allocation3 + $0x6c8] ss:$20 sps:$4 sm:$0xff]  }
  0xc3   :  { %1964 = vmatprep.subr.bf16.mxu1 %v3774_v6  ;;  %v3829_v6 = vld [vmem:[#allocation3 + $0x6a0] ss:$20 sps:$4 sm:$0xff]  }
  0xc4   :  { %1912 = vmatpush2.bf16.msra.mxu0 %v3769_v5  ;;  %v3828_v5 = vld [vmem:[#allocation3 + $0x588] ss:$20 sps:$4 sm:$0xff]  }
  0xc5   :  { %1913 = vmatprep.subr.bf16.mxu0 %v3777_v8  ;;  %v3831_v8 = vld [vmem:[#allocation3 + $0x678] ss:$20 sps:$4 sm:$0xff]  }
  0xc6   :  { %1965 = vmatpush2.bf16.msra.mxu1 %v3772_v7  ;;  %v3830_v7 = vld [vmem:[#allocation3 + $0x560] ss:$20 sps:$4 sm:$0xff]  }
  0xc7   :  { %1966 = vmatprep.subr.bf16.mxu1 %v3780_v10  ;;  %v3833_v10 = vld [vmem:[#allocation3 + $0x650] ss:$20 sps:$4 sm:$0xff]  }
  0xc8   :  { %1914 = vmatpush2.bf16.msra.mxu0 %v3775_v9  ;;  %v3832_v9 = vld [vmem:[#allocation3 + $0x538] ss:$20 sps:$4 sm:$0xff]  }
  0xc9   :  { %1915 = vmatprep.subr.bf16.mxu0 %v3783_v13 }
  0xca   :  { %1967 = vmatpush2.bf16.msra.mxu1 %v3778_v11  ;;  %v3834_v11 = vld [vmem:[#allocation3 + $0x510] ss:$20 sps:$4 sm:$0xff]  }
  0xcb   :  { %1968 = vmatprep.subr.bf16.mxu1 %v3786_v14 }
  0xcc   :  { %1916 = vmatpush2.bf16.msra.mxu0 %v3781_v16  ;;  %v340_v16 = vlaneseq }
  0xcd   :  { %3295 = vmatprep.subr.bf16.mxu0 %v3787_v17 }
  0xce   :  { %1969 = vmatpush2.bf16.msra.mxu1 %v3784_v18  ;;  %v4086_v18 = vshrl.u32 %v340_v16, 7 }
  0xcf   :  { %1918 = vmatmul.mubr.bf16.vlgmr.msra.gmra.mxu0 %v4050_v29  ;;  %3323 = vmatprep.subr.bf16.mxu1 %v3789_v19 }
  0xd0   :  { %3296 = vmatpush3.bf16.msra.mxu0 %v3788_v20  ;;  %1927 = vmatprep.mubr.bf16.mxu0 %v4007_v28  ;;  %v3803_v28 = vld [vmem:[#allocation3 + $0x1c8] ss:$20 sps:$4 sm:$0xff]  }
  0xd1   :  { %1971 = vmatmul.mubr.bf16.vlgmr.msra.gmra.mxu1 %v4027_v12  ;;  %3297 = vmatprep.subr.bf16.mxu0 %v3791_v21 }
  0xd2   :  { %3324 = vmatpush3.bf16.msra.mxu1 %v3790_v23  ;;  %1980 = vmatprep.mubr.bf16.mxu1 %v4032_v15  ;;  %v342_v23 = vsub.s32 0, %v4086_v18 }
  0xd3   :  { %3325 = vmatprep.subr.bf16.mxu1 %v3793_v25 }
  0xd4   :  { %3298 = vmatpush3.bf16.msra.mxu0 %v3792_v26 }
  0xd5   :  { %3299 = vmatprep.subr.bf16.mxu0 %v3795_v3 }
  0xd6   :  { %3326 = vmatpush3.bf16.msra.mxu1 %v3794_v31 }
  0xd7   :  { %1928 = vmatmul.mubr.bf16.gmra.mxu0 %v4012_v30  ;;  %3327 = vmatprep.subr.bf16.mxu1 %v3797_v24  ;;  %v3807_v30 = vld [vmem:[#allocation3 + $0x1a0] ss:$20 sps:$4 sm:$0xff]  }
  0xd8   :  { %3300 = vmatpush3.bf16.msra.mxu0 %v3796_v32  ;;  %2023 = vmatprep.mubr.bf16.mxu0 %v3876_v38 }
  0xd9   :  { %1981 = vmatmul.mubr.bf16.gmra.mxu1 %v4041_v22  ;;  %3301 = vmatprep.subr.bf16.mxu0 %v3799_v33 }
  0xda   :  { %3328 = vmatpush3.bf16.msra.mxu1 %v3798_v34  ;;  %2072 = vmatprep.mubr.bf16.mxu1 %v3877_v27 }
  0xdb   :  { %3329 = vmatprep.subr.bf16.mxu1 %v3801_v36 }
  0xdc   :  { %3302 = vmatpush3.bf16.msra.mxu0 %v3800_v35 }
  0xdd   :  { %3303 = vmatprep.subr.bf16.mxu0 %v3803_v28 }
  0xde   :  { %3330 = vmatpush3.bf16.msra.mxu1 %v3802_v37 }
  0xdf   :  { %3331 = vmatprep.subr.bf16.mxu1 %v3805_v51 }
  0xe0   :  { %3304 = vmatpush3.bf16.msra.mxu0 %v3804_v40 }
  0xe1   :  { %3305 = vmatprep.subr.bf16.mxu0 %v3807_v30 }
  0xe2   :  { %3332 = vmatpush3.bf16.msra.mxu1 %v3806_v41 }
  0xe3   :  { %3333 = vmatprep.subr.bf16.mxu1 %v3809_v39 }
  0xe4   :  { %3306 = vmatpush3.bf16.msra.mxu0 %v3808_v42 }
  0xe5   :  { %3307 = vmatprep.subr.bf16.mxu0 %v3811_v43 }
  0xe6   :  { %3334 = vmatpush3.bf16.msra.mxu1 %v3810_v44 }
  0xe7   :  { %3335 = vmatprep.subr.bf16.mxu1 %v3813_v45 }
  0xe8   :  { %3308 = vmatpush3.bf16.msra.mxu0 %v3812_v46 }
  0xe9   :  { %3309 = vmatprep.subr.bf16.mxu0 %v3815_v47 }
  0xea   :  { %3336 = vmatpush3.bf16.msra.mxu1 %v3814_v48 }
  0xeb   :  { %3337 = vmatprep.subr.bf16.mxu1 %v3817_v49 }
  0xec   :  { %3310 = vmatpush3.bf16.msra.mxu0 %v3816_v50 }
  0xed   :  { %3351 = vmatprep.subr.bf16.mxu0 %v3819_v52 }
  0xee   :  { %3338 = vmatpush3.bf16.msra.mxu1 %v3818_v53 }
  0xef   :  { %2024 = vmatmul.mubr.bf16.vlgmr.msra.gmra.mxu0 %v3878_v56 }
  0xf0   :  { %3352 = vmatpush3.bf16.msra.mxu0 %v3820_v54  ;;  %2031 = vmatprep.mubr.bf16.mxu0 %v3879_v58 }
  0xf1   :  { %2073 = vmatmul.mubr.bf16.vlgmr.msra.gmra.mxu1 %v4050_v29  ;;  %3353 = vmatprep.subr.bf16.mxu0 %v3821_v55 }
  0xf2   :  { %2080 = vmatprep.mubr.bf16.mxu1 %v3880_v60 }
  0xf4   :  { %3354 = vmatpush3.bf16.msra.mxu0 %v3822_v57 }
  0xf5   :  { %3355 = vmatprep.subr.bf16.mxu0 %v3823_v59 }
  0xf7   :  { %2032 = vmatmul.mubr.bf16.gmra.mxu0 %v3881_v63 }
  0xf8   :  { %3356 = vmatpush3.bf16.msra.mxu0 %v3824_v61  ;;  %2121 = vmatprep.mubr.bf16.mxu0 %v3882_v1 }
  0xf9   :  { %3357 = vmatprep.subr.bf16.mxu0 %v3825_v62  ;;  %2081 = vmatmul.mubr.bf16.gmra.mxu1 %v3883_v4 }
  0xfc   :  { %3358 = vmatpush3.bf16.msra.mxu0 %v3826_v0 }
  0xfd   :  { %3359 = vmatprep.subr.bf16.mxu0 %v3827_v2 }
 0x100   :  { %3360 = vmatpush3.bf16.msra.mxu0 %v3828_v5 }
 0x101   :  { %3361 = vmatprep.subr.bf16.mxu0 %v3829_v6 }
 0x104   :  { %3362 = vmatpush3.bf16.msra.mxu0 %v3830_v7 }
 0x105   :  { %3363 = vmatprep.subr.bf16.mxu0 %v3831_v8 }
 0x108   :  { %3364 = vmatpush3.bf16.msra.mxu0 %v3832_v9 }
 0x109   :  { %3365 = vmatprep.subr.bf16.mxu0 %v3833_v10 }
 0x10c   :  { %3366 = vmatpush3.bf16.msra.mxu0 %v3834_v11 }
 0x10f   :  { %2122 = vmatmul.mubr.bf16.vlgmr.msra.gmra.mxu0 %v4027_v12  ;;  %v1707_v13 = vpop.f32.mrf.mxu0  ;;  %v4092_v12 = vld [vmem:[%s4391_s2] sm:$0x1f] }
 0x110   :  { %2129 = vmatprep.mubr.bf16.mxu0 %v4032_v15  ;;  %v1760_v19 = vpop.f32.mrf.mxu1  ;;  %v346_v15 = vsub.s32 1, %v4086_v18  ;;  %v343_v26 = vrot.slane %v4092_v12, %v342_v23 }
 0x111   :  { %v1709_v14 = vpop.f32.mrf.mxu0 }
 0x112   :  { %v1762_v25 = vpop.f32.mrf.mxu1  ;;  %v347_v3 = vrot.slane %v4092_v12, %v346_v15  ;;  %v1708_v24 = vadd.f32 %v1707_v13, %v343_v26 }
 0x113   :  { %v1711_v17 = vpop.f32.mrf.mxu0 }
 0x114   :  { %v1764_v29 = vpop.f32.mrf.mxu1  ;;  %v1710_v33 = vadd.f32 %v1709_v14, %v347_v3  ;;  %v1712_v36 = vadd.f32 %v1711_v17, %v343_v26  ;;  %v1761_v28 = vadd.f32 %v1760_v19, %v1708_v24 }
 0x115   :  { %v1713_v20 = vpop.f32.mrf.mxu0 }
 0x116   :  { %v1766_v32 = vpop.f32.mrf.mxu1  ;;  %v1763_v38 = vadd.f32 %v1762_v25, %v1710_v33  ;;  %v1714_v51 = vadd.f32 %v1713_v20, %v347_v3  ;;  %v1765_v39 = vadd.f32 %v1764_v29, %v1712_v36 }
 0x117   :  { %2130 = vmatmul.mubr.bf16.gmra.mxu0 %v4041_v22  ;;  %v1717_v21 = vpop.f32.mrf.mxu0 }
 0x118   :  { %v1770_v34 = vpop.f32.mrf.mxu1  ;;  %v1718_v40 = vadd.f32 %v1717_v21, %v343_v26  ;;  %v1767_v45 = vadd.f32 %v1766_v32, %v1714_v51 }
 0x119   :  { %v1719_v22 = vpop.f32.mrf.mxu0 }
 0x11a   :  { %v1772_v27 = vpop.f32.mrf.mxu1  ;;  %v1720_v43 = vadd.f32 %v1719_v22, %v347_v3  ;;  %v1771_v48 = vadd.f32 %v1770_v34, %v1718_v40 }
 0x11b   :  { %v1721_v31 = vpop.f32.mrf.mxu0 }
 0x11c   :  { %v1774_v49 = vpop.f32.mrf.mxu1  ;;  %v1722_v53 = vadd.f32 %v1721_v31, %v343_v26  ;;  %v1773_v57 = vadd.f32 %v1772_v27, %v1720_v43 }
 0x11d   :  { %v1723_v35 = vpop.f32.mrf.mxu0 }
 0x11e   :  { %v1724_v58 = vadd.f32 %v1723_v35, %v347_v3  ;;  %v1776_v2 = vpop.f32.mrf.mxu1  ;;  %v1775_v8 = vadd.f32 %v1774_v49, %v1722_v53 }
 0x120   :  { %v1777_v17 = vadd.f32 %v1776_v2, %v1724_v58 }
 0x14f   :  { %v1813_v37 = vpop.f32.mrf.mxu0 }
 0x150   :  { %v1814_v30 = vadd.f32 %v1813_v37, %v1761_v28 }
 0x151   :  { %v1815_v41 = vpop.f32.mrf.mxu0  ;;  %v1866_v40 = vpop.f32.mrf.mxu1 }
 0x152   :  { %v1816_v42 = vadd.f32 %v1815_v41, %v1763_v38  ;;  %v2229_v50 = vmul.f32 %v1814_v30, %v1814_v30  ;;  %v2199_v54 = vrot.slane %v1814_v30, 5 }
 0x153   :  { %v1817_v44 = vpop.f32.mrf.mxu0  ;;  %v1868_v27 = vpop.f32.mrf.mxu1 }
 0x154   :  { %v2230_v46 = vmul.f32 %v1816_v42, %v1816_v42  ;;  %v1818_v47 = vadd.f32 %v1817_v44, %v1765_v39  ;;  %v2202_v59 = vrot.slane %v1816_v42, 5  ;;  %v354_v44 = vsub.s32 3, %v4086_v18 }
 0x155   :  { %v1819_v52 = vpop.f32.mrf.mxu0  ;;  %v1870_v41 = vpop.f32.mrf.mxu1 }
 0x156   :  { %v2200_v55 = vrot.slane %v1818_v47, 5  ;;  %v1820_v56 = vadd.f32 %v1819_v52, %v1767_v45  ;;  %v4099_v61 = vadd.f32 %v2230_v46, %v2229_v50  ;;  %v2234_v4 = vmul.f32 %v1818_v47, %v1818_v47 }
 0x157   :  { %v1823_v60 = vpop.f32.mrf.mxu0  ;;  %v4116_v37 = vpack.c.bf16 %v1818_v47, %v1814_v30  ;;  %v1872_v39 = vpop.f32.mrf.mxu1  ;;  %v355_v47 = vrot.slane %v4092_v12, %v354_v44 }
 0x158   :  { %v2201_v62 = vsel %vm2198_vm0, %v2199_v54, %v2200_v55  ;;  %v2203_v63 = vrot.slane %v1820_v56, 5  ;;  %v2235_v0 = vmul.f32 %v1820_v56, %v1820_v56  ;;  %v1824_v1 = vadd.f32 %v1823_v60, %v1771_v48 }
 0x159   :  { %v1825_v5 = vpop.f32.mrf.mxu0  ;;  %v4102_v6 = vpack.c.bf16 %v1820_v56, %v1816_v42  ;;  %v2219_v7 = vadd.f32 %v2201_v62, %v1814_v30  ;;  %v350_v30 = vsub.s32 2, %v4086_v18  ;;  %v1869_v52 = vadd.f32 %v1868_v27, %v355_v47 }
 0x15a   :  { %v1826_v9 = vadd.f32 %v1825_v5, %v1773_v57  ;;  %v2204_v10 = vsel %vm2198_vm0, %v2202_v59, %v2203_v63  ;;  %v4106_v16 = vadd.f32 %v2235_v0, %v2234_v4  ;;  %v2239_v19 = vmul.f32 %v1824_v1, %v1824_v1 }
 0x15b   :  { %2327 = vmatprep.mubr.bf16.mxu1 %v4102_v6  ;;  %v1827_v11 = vpop.f32.mrf.mxu0  ;;  %v2220_v13 = vadd.f32 %v2204_v10, %v1816_v42  ;;  %v2224_v14 = vmul.f32 0.5, %v2219_v7  ;;  %v4125_v42 = vpop.f32.mrf.mxu1  ;;  %v351_v46 = vrot.slane %v4092_v12, %v350_v30  ;;  %v1873_v62 = vadd.f32 %v1872_v39, %v355_v47  ;;  %v3835_v30 = vld [vmem:[%s4392_s3 + $0x78] sm:$0xff]  }
 0x15c   :  { %v2240_v20 = vmul.f32 %v1826_v9, %v1826_v9  ;;  %v1828_v21 = vadd.f32 %v1827_v11, %v1775_v8 }
 0x15d   :  { %v1829_v25 = vpop.f32.mrf.mxu0  ;;  %v2225_v15 = vmul.f32 0.5, %v2220_v13  ;;  %v2273_v22 = vmul.f32 %v2224_v14, %v2224_v14  ;;  %v2290_v33 = vpack.c.bf16 %v2224_v14, %v2224_v14  ;;  %v1878_v43 = vpop.f32.mrf.mxu1  ;;  %v1867_v49 = vadd.f32 %v1866_v40, %v351_v46 }
 0x15e   :  { %v4108_v26 = vadd.f32 %v2240_v20, %v2239_v19  ;;  %v1830_v29 = vadd.f32 %v1829_v25, %v1777_v17  ;;  %v2244_v24 = vmul.f32 %v1828_v21, %v1828_v21  ;;  %v4122_v51 = vpack.c.bf16 %v1828_v21, %v1824_v1 }
 0x15f   :  { %v2274_v3 = vmul.f32 %v2225_v15, %v2225_v15  ;;  %v2291_v31 = vpack.c.bf16 %v2225_v15, %v2225_v15  ;;  %v2279_v34 = vsel %vm2278_vm1, %v2273_v22, 0.0  ;;  %v1880_v45 = vpop.f32.mrf.mxu1  ;;  %v1871_v56 = vadd.f32 %v1870_v41, %v351_v46 }
 0x160   :  { %v2245_v32 = vmul.f32 %v1830_v29, %v1830_v29  ;;  %v4118_v38 = vpack.c.bf16 %v1830_v29, %v1826_v9 }
 0x161   :  { %2309 = vmatprep.subr.bf16.mxu1 %v2291_v31  ;;  %v2280_v35 = vsel %vm2278_vm1, %v2274_v3, 0.0  ;;  %v1882_v48 = vpop.f32.mrf.mxu1 }
 0x162   :  { %v4112_v36 = vadd.f32 %v2245_v32, %v2244_v24  ;;  %2310 = vmatpush1.bf16.xpose.msra.mxu1 %v2290_v33  ;;  %v4114_v28 = vadd.f32 %v2280_v35, %v2279_v34  ;;  %v1879_v33 = vadd.f32 %v1878_v43, %v355_v47  ;;  %v1883_v34 = vadd.f32 %v1882_v48, %v355_v47 }
 0x169   :  { %2328 = vmatmul.mubr.bf16.vlgmr.msra.gmra.mxu1 %v4116_v37 }
 0x16a   :  { %2335 = vmatprep.mubr.bf16.mxu1 %v4118_v38 }
 0x171   :  { %2336 = vmatmul.mubr.bf16.gmra.mxu1 %v4122_v51 }
 0x18f   :  { %v1919_v50 = vpop.f32.mrf.mxu0 }
 0x190   :  { %v1920_v53 = vadd.f32 %v1919_v50, %v1867_v49 }
 0x191   :  { %v1921_v54 = vpop.f32.mrf.mxu0  ;;  %v1972_v55 = vpop.f32.mrf.mxu1 }
 0x192   :  { %v1922_v57 = vadd.f32 %v1921_v54, %v1869_v52  ;;  %v1973_v58 = vadd.f32 %v1972_v55, %v1920_v53  ;;  %v1877_v52 = vadd.f32 %v4125_v42, %v351_v46  ;;  %v1881_v53 = vadd.f32 %v1880_v45, %v351_v46  ;;  %v3836_v55 = vld [vmem:[%s4392_s3 + $0x38] sm:$0xff]   ;;  %v3838_v42 = vld [vmem:[%s4392_s3 + $0x30] sm:$0xff]   ;;  %v3839_v45 = vld [vmem:[%s4392_s3 + $0x68] sm:$0xff]  }
 0x193   :  { %v1923_v59 = vpop.f32.mrf.mxu0  ;;  %v1974_v60 = vpop.f32.mrf.mxu1 }
 0x194   :  { %v1924_v63 = vadd.f32 %v1923_v59, %v1871_v56  ;;  %v1975_v0 = vadd.f32 %v1974_v60, %v1922_v57  ;;  %v2231_v1 = vmul.f32 %v1973_v58, %v1973_v58  ;;  %v2205_v13 = vrot.slane %v1973_v58, 5  ;;  %v3837_v57 = vld [vmem:[%s4392_s3 + $0x70] sm:$0xff]  }
 0x195   :  { %v1925_v2 = vpop.f32.mrf.mxu0  ;;  %v1976_v4 = vpop.f32.mrf.mxu1 }
 0x196   :  { %v1926_v5 = vadd.f32 %v1925_v2, %v1873_v62  ;;  %v4131_v7 = vadd.f32 %v1976_v4, %v1924_v63  ;;  %v2232_v8 = vmul.f32 %v1975_v0, %v1975_v0  ;;  %v2250_v11 = vadd.f32 %v4099_v61, %v2231_v1  ;;  %v3840_v62 = vld [vmem:[%s4392_s3 + $0x28] sm:$0xff]   ;;  %v3841_v1 = vld [vmem:[%s4392_s3 + $0x60] sm:$0xff]  }
 0x197   :  { %v1929_v9 = vpop.f32.mrf.mxu0  ;;  %v1978_v10 = vpop.f32.mrf.mxu1  ;;  %v2208_v15 = vrot.slane %v1975_v0, 5  ;;  %v3842_v2 = vld [vmem:[%s4392_s3 + $0x20] sm:$0xff]  }
 0x198   :  { %v2206_v14 = vrot.slane %v4131_v7, 5  ;;  %v4135_v17 = vadd.f32 %v1978_v10, %v1926_v5  ;;  %v4137_v21 = vadd.f32 %v2250_v11, %v2232_v8  ;;  %v4170_v56 = vpack.c.bf16 %v4131_v7, %v1973_v58  ;;  %v3843_v5 = vld [vmem:[%s4392_s3 + $0x58] sm:$0xff]   ;;  %v3846_v10 = vld [vmem:[%s4392_s3 + $0x10] sm:$0xff]  }
 0x199   :  { %v1931_v19 = vpop.f32.mrf.mxu0  ;;  %v1982_v20 = vpop.f32.mrf.mxu1  ;;  %v1930_v59 = vadd.f32 %v1929_v9, %v1877_v52  ;;  %v3844_v8 = vld [vmem:[%s4392_s3 + $0x18] sm:$0xff]   ;;  %v2236_v52 = vmul.f32 %v4131_v7, %v4131_v7 }
 0x19a   :  { %v2207_v25 = vsel %vm2198_vm0, %v2205_v13, %v2206_v14  ;;  %v2209_v22 = vrot.slane %v4135_v17, 5  ;;  %v4142_v29 = vpack.c.bf16 %v4135_v17, %v1975_v0  ;;  %v1932_v44 = vadd.f32 %v1931_v19, %v1879_v33  ;;  %v3847_v13 = vld [vmem:[%s4392_s3 + $0x48] sm:$0xff]  }
 0x19b   :  { %v2221_v3 = vadd.f32 %v2207_v25, %v1973_v58  ;;  %v1933_v31 = vpop.f32.mrf.mxu0  ;;  %v1984_v61 = vpop.f32.mrf.mxu1  ;;  %v4183_v46 = vadd.f32 %v1982_v20, %v1930_v59  ;;  %v3848_v20 = vld [vmem:[%s4392_s3 + $0x8] sm:$0xff]   ;;  %v3849_v25 = vld [vmem:[%s4392_s3 + $0x40] sm:$0xff]   ;;  %v2237_v7 = vmul.f32 %v4135_v17, %v4135_v17 }
 0x19c   :  { %2376 = vmatprep.mubr.bf16.mxu1 %v4142_v29  ;;  %v2210_v24 = vsel %vm2198_vm0, %v2208_v15, %v2209_v22  ;;  %v4157_v47 = vadd.f32 %v1984_v61, %v1932_v44  ;;  %v1934_v60 = vadd.f32 %v1933_v31, %v1881_v53  ;;  %v358_v31 = vsub.s32 4, %v4086_v18  ;;  %v3851_v61 = vld [vmem:[%s4392_s3 + $0x138] sm:$0xff]  }
 0x19d   :  { %v2222_v32 = vadd.f32 %v2210_v24, %v1975_v0  ;;  %v4146_v35 = vmul.f32 0.5, %v2221_v3  ;;  %v1935_v40 = vpop.f32.mrf.mxu0  ;;  %v1986_v27 = vpop.f32.mrf.mxu1  ;;  %v3850_v3 = vld [vmem:[%s4392_s3] sm:$0xff]  }
 0x19e   :  { %v1936_v49 = vadd.f32 %v1935_v40, %v1883_v34  ;;  %v4185_v58 = vadd.f32 %v1986_v27, %v1934_v60  ;;  %v4231_v33 = vrot.slane %v4092_v12, %v358_v31  ;;  %v3852_v40 = vld [vmem:[%s4392_s3 + $0x130] sm:$0xff]  }
 0x19f   :  { %v4148_v41 = vmul.f32 0.5, %v2222_v32  ;;  %v2292_v50 = vpack.c.bf16 %v4146_v35, %v4146_v35  ;;  %v1988_v43 = vpop.f32.mrf.mxu1 }
 0x1a0   :  { %v4159_v48 = vadd.f32 %v1988_v43, %v1936_v49  ;;  %v4192_v63 = vpack.c.bf16 %v4185_v58, %v4183_v46  ;;  %v3853_v43 = vld [vmem:[%s4392_s3 + $0x128] sm:$0xff]  }
 0x1a1   :  { %v2293_v39 = vpack.c.bf16 %v4148_v41, %v4148_v41 }
 0x1a2   :  { %v4164_v54 = vpack.c.bf16 %v4159_v48, %v4157_v47 }
 0x1a3   :  { %2358 = vmatprep.subr.bf16.mxu1 %v2293_v39 }
 0x1a4   :  { %2359 = vmatpush1.bf16.xpose.msra.mxu1 %v2292_v50 }
 0x1a5   :  { %3382 = vmatprep.subr.bf16.mxu1 %v3835_v30 }
 0x1ab   :  { %2377 = vmatmul.mubr.bf16.vlgmr.msra.gmra.mxu1 %v4170_v56 }
 0x1ac   :  { %3383 = vmatpush3.bf16.msra.mxu1 %v3836_v55  ;;  %2384 = vmatprep.mubr.bf16.mxu1 %v4164_v54 }
 0x1ad   :  { %3384 = vmatprep.subr.bf16.mxu1 %v3837_v57 }
 0x1af   :  { %v3311_v0 = vpop.f32.mrf.mxu0 }
 0x1b0   :  { %3385 = vmatpush3.bf16.msra.mxu1 %v3838_v42 }
 0x1b1   :  { %3386 = vmatprep.subr.bf16.mxu1 %v3839_v45  ;;  %v3312_v4 = vpop.f32.mrf.mxu0  ;;  %v3339_v14 = vpop.f32.mrf.mxu1  ;;  %v3854_v45 = vld [vmem:[%s4392_s3 + $0x120] sm:$0xff]  }
 0x1b2   :  { %v3313_v34 = vadd.f32 %v3312_v4, %v3311_v0  ;;  %v2256_v0 = vadd.f32 %v4106_v16, %v2236_v52  ;;  %v3855_v16 = vld [vmem:[%s4392_s3 + $0x118] sm:$0xff]  }
 0x1b3   :  { %2385 = vmatmul.mubr.bf16.gmra.mxu1 %v4192_v63  ;;  %v3314_v9 = vpop.f32.mrf.mxu0  ;;  %v3340_v15 = vpop.f32.mrf.mxu1 }
 0x1b4   :  { %3387 = vmatpush3.bf16.msra.mxu1 %v3840_v62  ;;  %2862 = vmatprep.mubr.bf16.mxu1 %v4102_v6  ;;  %v3845_v6 = vld [vmem:[%s4392_s3 + $0x50] sm:$0xff]   ;;  %v2026_v44 = vadd.f32 %v3313_v34, %v4231_v33  ;;  %v3341_v49 = vadd.f32 %v3340_v15, %v3339_v14  ;;  %v2241_v62 = vmul.f32 %v4183_v46, %v4183_v46 }
 0x1b5   :  { %3388 = vmatprep.subr.bf16.mxu1 %v3841_v1  ;;  %v3315_v11 = vpop.f32.mrf.mxu0  ;;  %v3342_v24 = vpop.f32.mrf.mxu1 }
 0x1b6   :  { %v3316_v30 = vadd.f32 %v3315_v11, %v3314_v9  ;;  %v2075_v59 = vadd.f32 %v3341_v49, %v2026_v44  ;;  %v2262_v17 = vadd.f32 %v4108_v26, %v2241_v62  ;;  %v2242_v11 = vmul.f32 %v4157_v47, %v4157_v47  ;;  %v3856_v47 = vld [vmem:[%s4392_s3 + $0x110] sm:$0xff]  }
 0x1b7   :  { %v3317_v19 = vpop.f32.mrf.mxu0  ;;  %v3343_v27 = vpop.f32.mrf.mxu1 }
 0x1b8   :  { %3389 = vmatpush3.bf16.msra.mxu1 %v3842_v2  ;;  %v3344_v57 = vadd.f32 %v3343_v27, %v3342_v24  ;;  %v2276_v24 = vmul.f32 %v4148_v41, %v4148_v41 }
 0x1b9   :  { %3390 = vmatprep.subr.bf16.mxu1 %v3843_v5  ;;  %v3318_v22 = vpop.f32.mrf.mxu0  ;;  %v3345_v50 = vpop.f32.mrf.mxu1 }
 0x1ba   :  { %v3319_v53 = vadd.f32 %v3318_v22, %v3317_v19  ;;  %v2284_v52 = vsel %vm2278_vm1, %v2276_v24, 0.0 }
 0x1bb   :  { %v3320_v32 = vpop.f32.mrf.mxu0  ;;  %v3346_v60 = vpop.f32.mrf.mxu1 }
 0x1bc   :  { %3391 = vmatpush3.bf16.msra.mxu1 %v3844_v8  ;;  %v2034_v1 = vadd.f32 %v3319_v53, %v4231_v33  ;;  %v3347_v2 = vadd.f32 %v3346_v60, %v3345_v50  ;;  %v2275_v8 = vmul.f32 %v4146_v35, %v4146_v35 }
 0x1bd   :  { %3392 = vmatprep.subr.bf16.mxu1 %v3845_v6  ;;  %v3321_v39 = vpop.f32.mrf.mxu0  ;;  %v3348_v46 = vpop.f32.mrf.mxu1 }
 0x1be   :  { %v2083_v14 = vadd.f32 %v3347_v2, %v2034_v1  ;;  %v3322_v19 = vadd.f32 %v3321_v39, %v3320_v32  ;;  %v2263_v39 = vadd.f32 %v2262_v17, %v2242_v11  ;;  %v3860_v2 = vld [vmem:[%s4392_s3 + $0xb8] sm:$0xff]   ;;  %v3869_v17 = vld [vmem:[%s4392_s3 + $0xd0] sm:$0xff]  }
 0x1bf   :  { %v3870_v11 = vld [vmem:[%s4392_s3 + $0x90] sm:$0xff]  }
 0x1c0   :  { %3393 = vmatpush3.bf16.msra.mxu1 %v3846_v10  ;;  %v2037_v49 = vadd.f32 %v3322_v19, %v4231_v33  ;;  %v3874_v19 = vld [vmem:[%s4392_s3 + $0x80] sm:$0xff]  }
 0x1c1   :  { %3394 = vmatprep.subr.bf16.mxu1 %v3847_v13  ;;  %v2257_v13 = vadd.f32 %v2256_v0, %v2237_v7  ;;  %v2247_v0 = vmul.f32 %v4159_v48, %v4159_v48 }
 0x1c4   :  { %3395 = vmatpush3.bf16.msra.mxu1 %v3848_v20 }
 0x1c5   :  { %3396 = vmatprep.subr.bf16.mxu1 %v3849_v25  ;;  %v2282_v25 = vsel %vm2278_vm1, %v2275_v8, 0.0 }
 0x1c6   :  { %v2283_v44 = vadd.f32 %v2282_v25, %v4114_v28  ;;  %v3859_v28 = vld [vmem:[%s4392_s3 + $0xf8] sm:$0xff]  }
 0x1c8   :  { %3397 = vmatpush3.bf16.msra.mxu1 %v3850_v3 }
 0x1c9   :  { %3454 = vmatprep.subr.bf16.mxu1 %v3851_v61 }
 0x1cb   :  { %2863 = vmatmul.mubr.bf16.vlgmr.msra.gmra.mxu1 %v4116_v37  ;;  %v2029_v37 = vadd.f32 %v3316_v30, %v4231_v33  ;;  %v2246_v33 = vmul.f32 %v4185_v58, %v4185_v58 }
 0x1cc   :  { %2870 = vmatprep.mubr.bf16.mxu1 %v4118_v38  ;;  %3455 = vmatpush3.bf16.msra.mxu1 %v3851_v61  ;;  %v3349_v61 = vpop.f32.mrf.mxu1 }
 0x1cd   :  { %3456 = vmatprep.subr.bf16.mxu1 %v3852_v40  ;;  %v2078_v9 = vadd.f32 %v3344_v57, %v2029_v37  ;;  %v3350_v50 = vadd.f32 %v3349_v61, %v3348_v46  ;;  %v2268_v58 = vadd.f32 %v4112_v36, %v2246_v33  ;;  %v3866_v46 = vld [vmem:[%s4392_s3 + $0xa0] sm:$0xff]  }
 0x1cf   :  { %v3367_v12 = vpop.f32.mrf.mxu0  ;;  %v2269_v36 = vadd.f32 %v2268_v58, %v2247_v0 }
 0x1d0   :  { %3457 = vmatpush3.bf16.msra.mxu1 %v3852_v40 }
 0x1d1   :  { %v3368_v55 = vpop.f32.mrf.mxu0  ;;  %3458 = vmatprep.subr.bf16.mxu1 %v3853_v43 }
 0x1d2   :  { %v3369_v38 = vadd.f32 %v3368_v55, %v3367_v12 }
 0x1d3   :  { %v3370_v42 = vpop.f32.mrf.mxu0  ;;  %2871 = vmatmul.mubr.bf16.gmra.mxu1 %v4122_v51 }
 0x1d4   :  { %v4254_v4 = vadd.f32 %v3369_v38, %v2075_v59  ;;  %3459 = vmatpush3.bf16.msra.mxu1 %v3853_v43  ;;  %v3857_v43 = vld [vmem:[%s4392_s3 + $0x108] sm:$0xff]   ;;  %v2086_v38 = vadd.f32 %v3350_v50, %v2037_v49  ;;  %v2285_v59 = vadd.f32 %v2284_v52, %v2283_v44 }
 0x1d5   :  { %v3371_v5 = vpop.f32.mrf.mxu0  ;;  %3460 = vmatprep.subr.bf16.mxu1 %v3854_v45 }
 0x1d6   :  { %v3372_v6 = vadd.f32 %v3371_v5, %v3370_v42  ;;  %v2211_v35 = vrot.slane %v4254_v4, 5  ;;  %v3858_v42 = vld [vmem:[%s4392_s3 + $0x100] sm:$0xff]   ;;  %v2233_v7 = vmul.f32 %v4254_v4, %v4254_v4 }
 0x1d7   :  { %v3373_v10 = vpop.f32.mrf.mxu0 }
 0x1d8   :  { %v2127_v51 = vadd.f32 %v3372_v6, %v2078_v9  ;;  %3461 = vmatpush3.bf16.msra.mxu1 %v3854_v45  ;;  %v2252_v1 = vadd.f32 %v4137_v21, %v2233_v7  ;;  %v3862_v21 = vld [vmem:[%s4392_s3 + $0xb0] sm:$0xff]   ;;  %v3863_v9 = vld [vmem:[%s4392_s3 + $0xe8] sm:$0xff]  }
 0x1d9   :  { %v3374_v20 = vpop.f32.mrf.mxu0  ;;  %3462 = vmatprep.subr.bf16.mxu1 %v3855_v16  ;;  %v3864_v6 = vld [vmem:[%s4392_s3 + $0xa8] sm:$0xff]  }
 0x1da   :  { %v2212_v15 = vrot.slane %v2127_v51, 5  ;;  %v3375_v22 = vadd.f32 %v3374_v20, %v3373_v10  ;;  %v2182_v3 = vpack.c.bf16 %v2127_v51, %v4254_v4  ;;  %v2238_v31 = vmul.f32 %v2127_v51, %v2127_v51  ;;  %v3867_v10 = vld [vmem:[%s4392_s3 + $0xd8] sm:$0xff]   ;;  %v3871_v51 = vld [vmem:[%s4392_s3 + $0xc8] sm:$0xff]  }
 0x1db   :  { %v3376_v26 = vpop.f32.mrf.mxu0 }
 0x1dc   :  { %v2132_v32 = vadd.f32 %v3375_v22, %v2083_v14  ;;  %3450 = vmatprep.mubr.bf16.mxu0 %v2182_v3  ;;  %3470 = vmatprep.mubr.bf16.mxu1 %v2182_v3  ;;  %v2258_v34 = vadd.f32 %v2257_v13, %v2238_v31  ;;  %v2213_v40 = vsel %vm2198_vm0, %v2211_v35, %v2212_v15  ;;  %v3872_v13 = vld [vmem:[%s4392_s3 + $0x88] sm:$0xff]   ;;  %v3873_v14 = vld [vmem:[%s4392_s3 + $0xc0] sm:$0xff]  }
 0x1dd   :  { %v3377_v27 = vpop.f32.mrf.mxu0  ;;  %v2223_v30 = vadd.f32 %v2213_v40, %v4254_v4  ;;  %3463 = vmatpush3.bf16.msra.mxu1 %v3855_v16  ;;  %v3861_v4 = vld [vmem:[%s4392_s3 + $0xf0] sm:$0xff]   ;;  %v3868_v16 = vld [vmem:[%s4392_s3 + $0x98] sm:$0xff]  }
 0x1de   :  { %2259 = vadd.xlane.f32.xlu1 %v2258_v34  ;;  %v2243_v12 = vmul.f32 %v2132_v32, %v2132_v32  ;;  %3464 = vmatprep.subr.bf16.mxu1 %v3856_v47  ;;  %v3378_v53 = vadd.f32 %v3377_v27, %v3376_v26 }
 0x1df   :  { %v2228_v41 = vmul.f32 0.5, %v2223_v30 }
 0x1e0   :  { %v2264_v55 = vadd.f32 %v2263_v39, %v2243_v12  ;;  %v2135_v45 = vadd.f32 %v3378_v53, %v2086_v38 }
 0x1e1   :  { %v2294_v37 = vpack.c.bf16 %v2228_v41, %v2228_v41  ;;  %v2277_v57 = vmul.f32 %v2228_v41, %v2228_v41  ;;  %3465 = vmatpush3.bf16.msra.mxu1 %v3856_v47 }
 0x1e2   :  { %2265 = vadd.xlane.f32.xlu1 %v2264_v55  ;;  %3466 = vmatprep.subr.bf16.mxu1 %v3857_v43  ;;  %v2248_v5 = vmul.f32 %v2135_v45, %v2135_v45  ;;  %v2187_v8 = vpack.c.bf16 %v2135_v45, %v2132_v32 }
 0x1e3   :  { %3448 = vmatprep.subr.bf16.mxu0 %v2294_v37  ;;  %v2286_v60 = vsel %vm2278_vm1, %v2277_v57, 0.0 }
 0x1e4   :  { %3449 = vmatpush3.bf16.xpose.msra.mxu0 %v2294_v37  ;;  %v2287_v62 = vadd.f32 %v2286_v60, %v2285_v59  ;;  %v2270_v48 = vadd.f32 %v2269_v36, %v2248_v5 }
 0x1e5   :  { %3410 = vmatprep.subr.bf16.mxu0 %v3859_v28  ;;  %3467 = vmatpush3.bf16.msra.mxu1 %v3857_v43  ;;  %v3254_v28 = vld [vmem:[%s4393_s4] ss:$0 sm:$0xff]  ;;  %s3931_s4 = smov [#allocation6]  }
 0x1e6   :  { %2288 = vadd.xlane.f32.xlu0 %v2287_v62  ;;  %3468 = vmatprep.subr.bf16.mxu1 %v3858_v42  ;;  %s2988_s2 = sshll.u32 %s3931_s4, 4  ;;  %s2989_s2 = int_to_ptr.vmem [resolvable:$true] %s2988_s2 }
 0x1e7   :  { %s3904_s21 = scalar_lea.vmem %s2989_s2, 512  ;;  %p3909_p6 = scmp.lt.s32.totalorder %s2989_s2, %s2989_s2 }
 0x1e8   :  { %p3905_p5 = scmp.ne.s32.totalorder %s2989_s2, %s3904_s21  ;;  %p3910_p7 = scmp.lt.s32.totalorder %s3904_s21, %s3904_s21 }
 0x1e9   :  { %3469 = vmatpush3.bf16.msra.mxu1 %v3858_v42 }
 0x1ea   :  { %2253 = vadd.xlane.f32.xlu0 %v2252_v1  ;;  %p3911_p8 = por %p3910_p7, %p3909_p6 }
 0x1eb   :  { %3451 = vmatmul.mubr.bf16.vlgmr.msra.gmra.mxu0 %v2187_v8 }
 0x1ec   :  { %3411 = vmatpush3.bf16.msra.mxu0 %v3860_v2  ;;  %2911 = vmatprep.mubr.bf16.mxu0 %v4142_v29  ;;  %v3865_v29 = vld [vmem:[%s4392_s3 + $0xe0] sm:$0xff]   ;;  %p3912_p9 = pnand %p3911_p8, %p3905_p5 }
 0x1ed   :  { %3471 = vmatmul.mubr.bf16.vlgmr.msra.gmra.mxu1 %v2187_v8  ;;  %3412 = vmatprep.subr.bf16.mxu0 %v3861_v4 }
 0x1ee   :  { %2271 = vadd.xlane.f32.xlu0 %v2270_v48 }
 0x1f0   :  { %3413 = vmatpush3.bf16.msra.mxu0 %v3862_v21 }
 0x1f1   :  { %3414 = vmatprep.subr.bf16.mxu0 %v3863_v9 }
 0x1f4   :  { %3415 = vmatpush3.bf16.msra.mxu0 %v3864_v6 }
 0x1f5   :  { %3416 = vmatprep.subr.bf16.mxu0 %v3865_v29 }
 0x1f8   :  { %3417 = vmatpush3.bf16.msra.mxu0 %v3866_v46 }
 0x1f9   :  { %3418 = vmatprep.subr.bf16.mxu0 %v3867_v10 }
 0x1fc   :  { %3419 = vmatpush3.bf16.msra.mxu0 %v3868_v16 }
 0x1fd   :  { %3420 = vmatprep.subr.bf16.mxu0 %v3869_v17 }
 0x200   :  { %3421 = vmatpush3.bf16.msra.mxu0 %v3870_v11 }
 0x201   :  { %3422 = vmatprep.subr.bf16.mxu0 %v3871_v51 }
 0x204   :  { %3423 = vmatpush3.bf16.msra.mxu0 %v3872_v13 }
 0x205   :  { %3424 = vmatprep.subr.bf16.mxu0 %v3873_v14 }
 0x208   :  { %3425 = vmatpush3.bf16.msra.mxu0 %v3874_v19 }
 0x20b   :  { %2912 = vmatmul.mubr.bf16.vlgmr.msra.gmra.mxu0 %v4170_v56 }
 0x20c   :  { %2919 = vmatprep.mubr.bf16.mxu0 %v4164_v54 }
 0x213   :  { %2920 = vmatmul.mubr.bf16.gmra.mxu0 %v4192_v63 }
 0x229   :  { %v4345_v35 = vpop.f32.mrf.mxu1 }
 0x22b   :  { %v2331_v20 = vpop.f32.mrf.mxu1 }
 0x22d   :  { %v4347_v25 = vpop.f32.mrf.mxu1 }
 0x22f   :  { %v2334_v15 = vpop.f32.mrf.mxu1 }
 0x231   :  { %v4349_v22 = vpop.f32.mrf.mxu1 }
 0x233   :  { %v2339_v3 = vpop.f32.mrf.mxu1 }
 0x235   :  { %v4351_v31 = vpop.f32.mrf.mxu1 }
 0x237   :  { %v2342_v61 = vpop.f32.mrf.mxu1 }
 0x26b   :  { %v4353_v26 = vpop.f32.mrf.mxu1 }
 0x26d   :  { %v2380_v47 = vpop.f32.mrf.mxu1 }
 0x26f   :  { %v2289_v56 = vpop.xlane.xlu0 %2288  ;;  %v4355_v54 = vpop.f32.mrf.mxu1 }
 0x270   :  { %2450 = vxpose.xlu1.b32.start.end [1/1] (short) (narrow) %v2289_v56, 8 }
 0x271   :  { %v2383_v63 = vpop.f32.mrf.mxu1 }
 0x273   :  { %v4357_v24 = vpop.f32.mrf.mxu1 }
 0x275   :  { %v2388_v32 = vpop.f32.mrf.mxu1 }
 0x277   :  { %v4359_v34 = vpop.f32.mrf.mxu1 }
 0x279   :  { %v2391_v40 = vpop.f32.mrf.mxu1 }
 0x28b   :  { %v3398_v27 = vpop.f32.mrf.mxu1 }
 0x28d   :  { %v3399_v39 = vpop.f32.mrf.mxu1 }
 0x28e   :  { %v3400_v57 = vadd.f32 %v3399_v39, %v3398_v27 }
 0x28f   :  { %v3401_v30 = vpop.f32.mrf.mxu1 }
 0x290   :  { %v2865_v60 = vadd.f32 %v3400_v57, %v3254_v28 }
 0x291   :  { %v3402_v44 = vpop.f32.mrf.mxu1 }
 0x292   :  { %v3403_v42 = vadd.f32 %v3402_v44, %v3401_v30 }
 0x293   :  { %v3404_v49 = vpop.f32.mrf.mxu1 }
 0x294   :  { %v2868_v1 = vadd.f32 %v3403_v42, %v3254_v28 }
 0x295   :  { %v3405_v12 = vpop.f32.mrf.mxu1 }
 0x296   :  { %v3406_v2 = vadd.f32 %v3405_v12, %v3404_v49 }
 0x297   :  { %v3407_v43 = vpop.f32.mrf.mxu1 }
 0x298   :  { %v2873_v9 = vadd.f32 %v3406_v2, %v3254_v28 }
 0x299   :  { %v3408_v53 = vpop.f32.mrf.mxu1 }
 0x29a   :  { %v3409_v6 = vadd.f32 %v3408_v53, %v3407_v43 }
 0x29c   :  { %v2876_v11 = vadd.f32 %v3409_v6, %v3254_v28 }
 0x2ab   :  { %v3452_v50 = vpop.f32.mrf.mxu0 }
 0x2ad   :  { %v2427_v41 = vpop.f32.mrf.mxu0  ;;  %v3472_v55 = vpop.f32.mrf.mxu1 }
 0x2af   :  { %v3453_v52 = vpop.f32.mrf.mxu0  ;;  %v2962_v38 = vpop.f32.mrf.mxu1 }
 0x2b1   :  { %v2430_v37 = vpop.f32.mrf.mxu0  ;;  %v3473_v58 = vpop.f32.mrf.mxu1 }
 0x2b3   :  { %v2965_v48 = vpop.f32.mrf.mxu1 }
 0x2cb   :  { %v3426_v33 = vpop.f32.mrf.mxu0 }
 0x2cd   :  { %v3427_v59 = vpop.f32.mrf.mxu0 }
 0x2ce   :  { %v3428_v45 = vadd.f32 %v3427_v59, %v3426_v33 }
 0x2cf   :  { %v3429_v62 = vpop.f32.mrf.mxu0 }
 0x2d0   :  { %v2914_v7 = vadd.f32 %v3428_v45, %v2865_v60 }
 0x2d1   :  { %v3430_v0 = vpop.f32.mrf.mxu0 }
 0x2d2   :  { %v2963_v5 = vadd.f32 %v2962_v38, %v2914_v7  ;;  %v3431_v8 = vadd.f32 %v3430_v0, %v3429_v62 }
 0x2d3   :  { %v3432_v4 = vpop.f32.mrf.mxu0 }
 0x2d4   :  { %2977 = vst [vmem:[#allocation6] sm:$0xff] %v2963_v5  ;;  %v2917_v36 = vadd.f32 %v3431_v8, %v2868_v1 }
 0x2d5   :  { %v3433_v21 = vpop.f32.mrf.mxu0 }
 0x2d6   :  { %v2966_v29 = vadd.f32 %v2965_v48, %v2917_v36  ;;  %v3434_v46 = vadd.f32 %v3433_v21, %v3432_v4 }
 0x2d7   :  { %v3435_v10 = vpop.f32.mrf.mxu0 }
 0x2d8   :  { %2978 = vst [vmem:[#allocation6 + $0x8] sm:$0xff] %v2966_v29  ;;  %v2922_v16 = vadd.f32 %v3434_v46, %v2873_v9 }
 0x2d9   :  { %v3436_v17 = vpop.f32.mrf.mxu0 }
 0x2da   :  { %v2971_v51 = vadd.f32 %v3472_v55, %v2922_v16  ;;  %v3437_v13 = vadd.f32 %v3436_v17, %v3435_v10 }
 0x2dc   :  { %2979 = vst [vmem:[#allocation6 + $0x10] sm:$0xff] %v2971_v51  ;;  %v2925_v14 = vadd.f32 %v3437_v13, %v2876_v11 }
 0x2de   :  { %v2974_v19 = vadd.f32 %v3473_v58, %v2925_v14 }
 0x2e0   :  { %2980 = vst [vmem:[#allocation6 + $0x18] sm:$0xff] %v2974_v19 }
 0x2e1   :  { %3915 = shalt.err (!%p3912_p9)
}
 0x2e2   :  { %s3932_s22 = smov 128   ;;  %s3933_s23 = smov 8   ;;  %v2260_v20 = vpop.xlane.xlu1 %2259  ;;  %v2387_v15 = vadd.f32 %v4357_v24, %v4349_v22  ;;  %v2379_v3 = vadd.f32 %v4353_v26, %v4345_v35  ;;  %v2382_v61 = vadd.f32 %v4355_v54, %v4347_v25  ;;  %v2390_v47 = vadd.f32 %v4359_v34, %v4351_v31  ;;  %v2254_v27 = vpop.xlane.xlu0 %2253 }
 0x2e3   :  { %2994 = dma.vmem_to_hbm [thread:$0]  %s2989_s2, 512, %s4395_s6, [#allocation5], %s3932_s22, %s3932_s22, %s3933_s23   ;;  %vm2498_vm2 = vcmask 39936  }
 0x2e4   :  { %v2436_v56 = vadd.f32 %v3452_v50, %v2387_v15  ;;  %v2428_v63 = vadd.f32 %v2427_v41, %v2379_v3  ;;  %v2439_v32 = vadd.f32 %v3453_v52, %v2390_v47  ;;  %v2431_v40 = vadd.f32 %v2430_v37, %v2382_v61 }
 0x2e6   :  { %v2266_v39 = vpop.xlane.xlu1 %2265  ;;  %v2444_v30 = vmul.f32 2.0, %v2436_v56  ;;  %v2442_v44 = vmul.f32 2.0, %v2428_v63  ;;  %v2445_v49 = vmul.f32 2.0, %v2439_v32  ;;  %v2443_v12 = vmul.f32 2.0, %v2431_v40  ;;  %v2272_v22 = vpop.xlane.xlu0 %2271 }
 0x2e8   :  { %v2448_v24 = vsub.f32 %v2266_v39, %v2444_v30  ;;  %v2446_v35 = vsub.f32 %v2254_v27, %v2442_v44  ;;  %v2449_v26 = vsub.f32 %v2272_v22, %v2445_v49  ;;  %v2447_v53 = vsub.f32 %v2260_v20, %v2443_v12 }
 0x2ec   :  { %v2466_v43 = vpop.trf.xlu1 }
 0x2ed   :  { %v2485_v25 = vrot.slane %v2466_v43, %v342_v23 }
 0x2ef   :  { %v2486_v31 = vadd.f32 %v2485_v25, %v2446_v35  ;;  %v2487_v54 = vadd.f32 %v2485_v25, %v2447_v53  ;;  %v2488_v34 = vadd.f32 %v2485_v25, %v2448_v24  ;;  %v2489_v50 = vadd.f32 %v2485_v25, %v2449_v26 }
 0x2f1   :  { %v2490_v41 = vsub.f32 0.0, %v2486_v31  ;;  %v2491_v52 = vsub.f32 0.0, %v2487_v54  ;;  %v2492_v55 = vsub.f32 0.0, %v2488_v34  ;;  %v2493_v37 = vsub.f32 0.0, %v2489_v50 }
 0x2f3   :  { %v2494_v57 = vmul.f32 0.015625, %v2490_v41  ;;  %v2495_v28 = vmul.f32 0.015625, %v2491_v52  ;;  %v2496_v33 = vmul.f32 0.015625, %v2492_v55  ;;  %v2497_v38 = vmul.f32 0.015625, %v2493_v37 }
 0x2f5   :  { %2499 = vst.msk [vmem:[%s4394_s5] sm:$0xff] %vm2498_vm2, %v2494_v57  ;;  %2500 = vst.msk [vmem:[%s4394_s5 + $0x8] sm:$0xff] %vm2498_vm2, %v2495_v28 }
 0x2f6   :  { %2501 = vst.msk [vmem:[%s4394_s5 + $0x10] sm:$0xff] %vm2498_vm2, %v2496_v33  ;;  %2502 = vst.msk [vmem:[%s4394_s5 + $0x18] sm:$0xff] %vm2498_vm2, %v2497_v38 }
 0x2f7   :  { %3926 = dma.done.wait [#allocation5], 512  }
 0x2f8   :  { %3927 = vsyncadd [#allocation5], 4294966784 }
 0x2f9   :  { %3000 = vsyncpa [#allocation4], 1 }
 0x2fa   :  { %3001 = vsyncpa [#allocation5], 1 }

</bundles_post_ra>
